<compile_context>
chip_gen: v5e
topology: v5e:2x2
jax: 0.10.0
libtpu: 0.0.40
codegen_flags: <defaults>
</compile_context>

<pallas_src>
import functools

import jax
import jax.numpy as jnp
from jax import lax
from jax.experimental import pallas as pl
from jax.experimental.pallas import tpu as pltpu


def _round_up(n, m):
    return ((n + m - 1) // m) * m


def _lnn_kernel(num_layers, x_ref, w_in0_ref, w_in_rest_ref, w_h_ref,
                b_ref, inv_tau_ref, w_out_ref, b_out_ref, out_ref, xproj_ref):
    T, B_pad, in_pad = x_ref.shape
    hid_pad = w_h_ref.shape[-1]
    cdtype = w_h_ref.dtype          # MXU operand dtype (f32 default, bf16 opt)

    # ---- (1) Hoisted, time-parallel layer-0 input projection ---------------
    # Single big dot amortizes MXU fill/drain over all timesteps and removes
    # the zero-padded input-K columns from the per-step critical path.
    # Fused bias (b_in0 + b_h0) is folded in here.
    x_all = x_ref[...].reshape(T * B_pad, in_pad)
    proj = (jnp.dot(x_all.astype(cdtype), w_in0_ref[...],
                    preferred_element_type=jnp.float32)
            + b_ref[0])                                   # (1, hid_pad) bcast
    xproj_ref[...] = proj.reshape(T, B_pad, hid_pad)

    # ---- (2) Hoist bias / inv_tau broadcasts out of the time loop ----------
    biases = [jnp.broadcast_to(b_ref[i], (B_pad, hid_pad))
              for i in range(1, num_layers)]
    inv_taus = [jnp.broadcast_to(inv_tau_ref[i], (B_pad, hid_pad))
                for i in range(num_layers)]

    # ---- (3) Recurrence: state carried in vregs via fori_loop carry --------
    def step(t, hs):
        hs = list(hs)
        x_t = None
        for i in range(num_layers):
            h_i = hs[i]
            h_dot = jnp.dot(h_i.astype(cdtype), w_h_ref[i],
                            preferred_element_type=jnp.float32)
            if i == 0:
                pre = xproj_ref[t] + h_dot
            else:
                pre = (jnp.dot(x_t.astype(cdtype), w_in_rest_ref[i - 1],
                               preferred_element_type=jnp.float32)
                       + h_dot + biases[i - 1])
            dx = jnp.tanh(pre)
            h_new = h_i + (dx - h_i) * inv_taus[i]
            hs[i] = h_new
            x_t = h_new
        return tuple(hs)

    h0 = tuple(jnp.zeros((B_pad, hid_pad), jnp.float32)
               for _ in range(num_layers))
    unroll = True if T <= 32 else 8   # full unroll for short T, factor-8 else
    hs = lax.fori_loop(0, T, step, h0, unroll=unroll)

    # ---- Output projection --------------------------------------------------
    out_ref[...] = (jnp.dot(hs[-1].astype(cdtype), w_out_ref[...],
                            preferred_element_type=jnp.float32)
                    + b_out_ref[...])


def liquid_neural_network(x, params, *, weight_dtype=jnp.float32):
    B, T, in_dim = x.shape
    num_layers = len(params["layers"])
    hidden = params["layers"][0]["w_in"].shape[1]
    out_dim = params["w_out"].shape[1]

    f32 = jnp.float32

    # Pad to lane/sublane friendly shapes (zero padding keeps semantics:
    # padded hidden columns stay exactly 0 because W/b pads are 0 and the
    # 1/tau pad is 1, so padded state never becomes non-zero).
    B_pad = _round_up(B, 8)
    in_pad = _round_up(in_dim, 128)
    hid_pad = _round_up(hidden, 128)
    out_pad = _round_up(out_dim, 128)

    # x: (B, T, in) -> time-major padded (T, B_pad, in_pad).
    x_tm = jnp.transpose(x.astype(f32), (1, 0, 2))
    x_tm = jnp.pad(x_tm, ((0, 0), (0, B_pad - B), (0, in_pad - in_dim)))

    # Stacked / fused parameters (few, large pallas_call operands).
    w_in0 = jnp.zeros((in_pad, hid_pad), f32).at[:in_dim, :hidden].set(
        params["layers"][0]["w_in"].astype(f32))

    n_rest = max(num_layers - 1, 1)
    w_in_rest = jnp.zeros((n_rest, hid_pad, hid_pad), f32)
    w_h = jnp.zeros((num_layers, hid_pad, hid_pad), f32)
    b_cat = jnp.zeros((num_layers, 1, hid_pad), f32)
    inv_tau = jnp.ones((num_layers, 1, hid_pad), f32)
    for i, lp in enumerate(params["layers"]):
        w_h = w_h.at[i, :hidden, :hidden].set(lp["w_h"].astype(f32))
        b_cat = b_cat.at[i, 0, :hidden].set(
            (lp["b_in"] + lp["b_h"]).reshape(-1).astype(f32))
        inv_tau = inv_tau.at[i, 0, :hidden].set(
            (1.0 / lp["tau"]).reshape(-1).astype(f32))
        if i >= 1:
            w_in_rest = w_in_rest.at[i - 1, :hidden, :hidden].set(
                lp["w_in"].astype(f32))

    w_out = jnp.zeros((hid_pad, out_pad), f32).at[:hidden, :out_dim].set(
        params["w_out"].astype(f32))
    b_out = jnp.zeros((1, out_pad), f32).at[:, :out_dim].set(
        params["b_out"].reshape(1, -1).astype(f32))

    # Optional bf16 MXU-operand path (v6e / v7x): fewer MXU passes per step,
    # half the resident weight bytes; accumulation / state math stays f32.
    w_in0 = w_in0.astype(weight_dtype)
    w_in_rest = w_in_rest.astype(weight_dtype)
    w_h = w_h.astype(weight_dtype)
    w_out = w_out.astype(weight_dtype)

    inputs = (x_tm, w_in0, w_in_rest, w_h, b_cat, inv_tau, w_out, b_out)

    # Everything is VMEM-resident: raise the scoped VMEM limit only when it is
    # actually needed, and keep headroom under v7x's 64 MiB physical VMEM.
    # For long T on v7x, x should instead be streamed from HBM in time chunks
    # (memory_space=pl.ANY + manual double-buffered DMA) — not needed here.
    total_bytes = sum(int(a.size) * a.dtype.itemsize for a in inputs)
    total_bytes += B_pad * out_pad * 4                 # output
    total_bytes += T * B_pad * hid_pad * 4             # xproj scratch
    vmem_limit = None
    if total_bytes > (24 << 20):
        vmem_limit = min(total_bytes + (16 << 20), 48 << 20)

    kernel = functools.partial(_lnn_kernel, num_layers)
    vmem_spec = pl.BlockSpec(memory_space=pltpu.MemorySpace.VMEM)

    out_padded = pl.pallas_call(
        kernel,
        out_shape=jax.ShapeDtypeStruct((B_pad, out_pad), jnp.float32),
        in_specs=[vmem_spec] * len(inputs),
        out_specs=vmem_spec,
        scratch_shapes=[pltpu.VMEM((T, B_pad, hid_pad), jnp.float32)],
        compiler_params=pltpu.CompilerParams(vmem_limit_bytes=vmem_limit),
    )(*inputs)

    return out_padded[:B, :out_dim]


def init_params(key, input_dim, hidden_dim, num_layers, output_dim):
    layers = []
    for i in range(num_layers):
        in_dim = input_dim if i == 0 else hidden_dim
        key, k1, k2, k3, k4 = jax.random.split(key, 5)
        b_in = 1.0 / float(in_dim) ** 0.5
        b_h = 1.0 / float(hidden_dim) ** 0.5
        layers.append({
            "w_in": jax.random.uniform(k1, (in_dim, hidden_dim), jnp.float32,
                                       -b_in, b_in),
            "b_in": jax.random.uniform(k2, (1, hidden_dim), jnp.float32,
                                       -b_in, b_in),
            "w_h": jax.random.uniform(k3, (hidden_dim, hidden_dim), jnp.float32,
                                      -b_h, b_h),
            "b_h": jax.random.uniform(k4, (1, hidden_dim), jnp.float32,
                                      -b_h, b_h),
            "tau": jnp.ones((1, hidden_dim), jnp.float32),
        })
    key, k1, k2 = jax.random.split(key, 3)
    b_o = 1.0 / float(hidden_dim) ** 0.5
    w_out = jax.random.uniform(k1, (hidden_dim, output_dim), jnp.float32,
                               -b_o, b_o)
    b_out = jax.random.uniform(k2, (1, output_dim), jnp.float32, -b_o, b_o)
    return {"layers": layers, "w_out": w_out, "b_out": b_out}


def reference_lnn(x, params):
    """Pure-JAX reference matching the PyTorch forward semantics."""
    B, T, _ = x.shape
    num_layers = len(params["layers"])
    hidden = params["layers"][0]["w_in"].shape[1]
    h = [jnp.zeros((B, hidden), jnp.float32) for _ in range(num_layers)]
    for t in range(T):
        x_t = x[:, t, :]
        for i, lp in enumerate(params["layers"]):
            pre = x_t @ lp["w_in"] + lp["b_in"] + h[i] @ lp["w_h"] + lp["b_h"]
            dx = jnp.tanh(pre)
            h[i] = h[i] + (dx - h[i]) / lp["tau"]
            x_t = h[i]
    return h[-1] @ params["w_out"] + params["b_out"]


if __name__ == "__main__":
    B, T = 4, 8
    input_dim, hidden_dim, num_layers, output_dim = 8, 32, 2, 8

    key = jax.random.PRNGKey(0)
    key, kx, kp = jax.random.split(key, 3)
    x = jax.random.normal(kx, (B, T, input_dim), jnp.float32)
    params = init_params(kp, input_dim, hidden_dim, num_layers, output_dim)

    out = jax.jit(liquid_neural_network)(x, params)
    out = jax.block_until_ready(out)

    ref = reference_lnn(x, params)
    assert out.shape == (B, output_dim)
    assert jnp.allclose(out, ref, atol=1e-4, rtol=1e-4), "mismatch vs reference"

    print("KERNEL_OK")
</pallas_src>

<mosaic_0001>
module attributes {stable_mosaic.version = 11 : i64} {
  func.func @_lnn_kernel(%arg0: memref<8x8x128xf32, #tpu.memory_space<vmem>>, %arg1: memref<128x128xf32, #tpu.memory_space<vmem>>, %arg2: memref<1x128x128xf32, #tpu.memory_space<vmem>>, %arg3: memref<2x128x128xf32, #tpu.memory_space<vmem>>, %arg4: memref<2x1x128xf32, #tpu.memory_space<vmem>>, %arg5: memref<2x1x128xf32, #tpu.memory_space<vmem>>, %arg6: memref<128x128xf32, #tpu.memory_space<vmem>>, %arg7: memref<1x128xf32, #tpu.memory_space<vmem>>, %arg8: memref<8x128xf32, #tpu.memory_space<vmem>>, %arg9: memref<8x8x128xf32, #tpu.memory_space<vmem>>) attributes {dimension_semantics = [], scalar_prefetch = 0 : i64, scratch_operands = 1 : i64, tpu.core_type = #tpu.core_type<tc>} {
    %c0 = arith.constant 0 : index
    %c0_0 = arith.constant 0 : index
    %c0_1 = arith.constant 0 : index
    %0 = vector.load %arg0[%c0, %c0_0, %c0_1] : memref<8x8x128xf32, #tpu.memory_space<vmem>>, vector<8x8x128xf32>
    %1 = vector.shape_cast %0 : vector<8x8x128xf32> to vector<64x128xf32>
    %c0_2 = arith.constant 0 : index
    %c0_3 = arith.constant 0 : index
    %2 = vector.load %arg1[%c0_2, %c0_3] : memref<128x128xf32, #tpu.memory_space<vmem>>, vector<128x128xf32>
    %cst = arith.constant dense<0.000000e+00> : vector<64x128xf32>
    %3 = tpu.matmul %1, %2, %cst {dimension_numbers = #tpu.dot_dimension_numbers<[1], [0], [0], [1], [0, 0, 1, 1], [], []>} : vector<64x128xf32>, vector<128x128xf32>, vector<64x128xf32> -> vector<64x128xf32>
    %c0_4 = arith.constant 0 : index
    %c0_5 = arith.constant 0 : index
    %c0_6 = arith.constant 0 : index
    %4 = vector.load %arg4[%c0_4, %c0_5, %c0_6] : memref<2x1x128xf32, #tpu.memory_space<vmem>>, vector<1x1x128xf32>
    %5 = vector.shape_cast %4 : vector<1x1x128xf32> to vector<1x128xf32>
    %6 = vector.broadcast %5 : vector<1x128xf32> to vector<64x128xf32>
    %7 = arith.addf %3, %6 : vector<64x128xf32>
    %8 = vector.shape_cast %7 : vector<64x128xf32> to vector<8x8x128xf32>
    %c0_7 = arith.constant 0 : index
    %c0_8 = arith.constant 0 : index
    %c0_9 = arith.constant 0 : index
    %9 = vector.load %arg9[%c0_7, %c0_8, %c0_9] : memref<8x8x128xf32, #tpu.memory_space<vmem>>, vector<8x8x128xf32>
    tpu.vector_store %arg9[%c0_7, %c0_8, %c0_9], %8 {strides = array<i32>} : memref<8x8x128xf32, #tpu.memory_space<vmem>>, vector<8x8x128xf32>,
    %c1 = arith.constant 1 : index
    %c0_10 = arith.constant 0 : index
    %c0_11 = arith.constant 0 : index
    %10 = vector.load %arg4[%c1, %c0_10, %c0_11] : memref<2x1x128xf32, #tpu.memory_space<vmem>>, vector<1x1x128xf32>
    %11 = vector.shape_cast %10 : vector<1x1x128xf32> to vector<1x128xf32>
    %12 = vector.shape_cast %11 : vector<1x128xf32> to vector<1x128xf32>
    %13 = vector.broadcast %12 : vector<1x128xf32> to vector<8x128xf32>
    %c0_12 = arith.constant 0 : index
    %c0_13 = arith.constant 0 : index
    %c0_14 = arith.constant 0 : index
    %14 = vector.load %arg5[%c0_12, %c0_13, %c0_14] : memref<2x1x128xf32, #tpu.memory_space<vmem>>, vector<1x1x128xf32>
    %15 = vector.shape_cast %14 : vector<1x1x128xf32> to vector<1x128xf32>
    %16 = vector.shape_cast %15 : vector<1x128xf32> to vector<1x128xf32>
    %17 = vector.broadcast %16 : vector<1x128xf32> to vector<8x128xf32>
    %c1_15 = arith.constant 1 : index
    %c0_16 = arith.constant 0 : index
    %c0_17 = arith.constant 0 : index
    %18 = vector.load %arg5[%c1_15, %c0_16, %c0_17] : memref<2x1x128xf32, #tpu.memory_space<vmem>>, vector<1x1x128xf32>
    %19 = vector.shape_cast %18 : vector<1x1x128xf32> to vector<1x128xf32>
    %20 = vector.shape_cast %19 : vector<1x128xf32> to vector<1x128xf32>
    %21 = vector.broadcast %20 : vector<1x128xf32> to vector<8x128xf32>
    %cst_18 = arith.constant 0.000000e+00 : f32
    %22 = vector.broadcast %cst_18 : f32 to vector<8x128xf32>
    %cst_19 = arith.constant 0.000000e+00 : f32
    %23 = vector.broadcast %cst_19 : f32 to vector<8x128xf32>
    %c0_i32 = arith.constant 0 : i32
    %c0_20 = arith.constant 0 : index
    %c0_21 = arith.constant 0 : index
    %c0_22 = arith.constant 0 : index
    %24 = vector.load %arg3[%c0_20, %c0_21, %c0_22] : memref<2x128x128xf32, #tpu.memory_space<vmem>>, vector<1x128x128xf32>
    %25 = vector.shape_cast %24 : vector<1x128x128xf32> to vector<128x128xf32>
    %cst_23 = arith.constant dense<0.000000e+00> : vector<8x128xf32>
    %26 = tpu.matmul %22, %25, %cst_23 {dimension_numbers = #tpu.dot_dimension_numbers<[1], [0], [0], [1], [0, 0, 1, 1], [], []>} : vector<8x128xf32>, vector<128x128xf32>, vector<8x128xf32> -> vector<8x128xf32>
    %27 = arith.index_cast %c0_i32 : i32 to index
    %c0_24 = arith.constant 0 : index
    %c0_25 = arith.constant 0 : index
    %28 = vector.load %arg9[%27, %c0_24, %c0_25] : memref<8x8x128xf32, #tpu.memory_space<vmem>>, vector<1x8x128xf32>
    %29 = vector.shape_cast %28 : vector<1x8x128xf32> to vector<8x128xf32>
    %30 = arith.addf %29, %26 : vector<8x128xf32>
    %31 = math.tanh %30 : vector<8x128xf32>
    %32 = arith.subf %31, %22 : vector<8x128xf32>
    %33 = arith.mulf %32, %17 : vector<8x128xf32>
    %34 = arith.addf %22, %33 : vector<8x128xf32>
    %c1_26 = arith.constant 1 : index
    %c0_27 = arith.constant 0 : index
    %c0_28 = arith.constant 0 : index
    %35 = vector.load %arg3[%c1_26, %c0_27, %c0_28] : memref<2x128x128xf32, #tpu.memory_space<vmem>>, vector<1x128x128xf32>
    %36 = vector.shape_cast %35 : vector<1x128x128xf32> to vector<128x128xf32>
    %cst_29 = arith.constant dense<0.000000e+00> : vector<8x128xf32>
    %37 = tpu.matmul %23, %36, %cst_29 {dimension_numbers = #tpu.dot_dimension_numbers<[1], [0], [0], [1], [0, 0, 1, 1], [], []>} : vector<8x128xf32>, vector<128x128xf32>, vector<8x128xf32> -> vector<8x128xf32>
    %c0_30 = arith.constant 0 : index
    %c0_31 = arith.constant 0 : index
    %c0_32 = arith.constant 0 : index
    %38 = vector.load %arg2[%c0_30, %c0_31, %c0_32] : memref<1x128x128xf32, #tpu.memory_space<vmem>>, vector<1x128x128xf32>
    %39 = vector.shape_cast %38 : vector<1x128x128xf32> to vector<128x128xf32>
    %cst_33 = arith.constant dense<0.000000e+00> : vector<8x128xf32>
    %40 = tpu.matmul %34, %39, %cst_33 {dimension_numbers = #tpu.dot_dimension_numbers<[1], [0], [0], [1], [0, 0, 1, 1], [], []>} : vector<8x128xf32>, vector<128x128xf32>, vector<8x128xf32> -> vector<8x128xf32>
    %41 = arith.addf %40, %37 : vector<8x128xf32>
    %42 = arith.addf %41, %13 : vector<8x128xf32>
    %43 = math.tanh %42 : vector<8x128xf32>
    %44 = arith.subf %43, %23 : vector<8x128xf32>
    %45 = arith.mulf %44, %21 : vector<8x128xf32>
    %46 = arith.addf %23, %45 : vector<8x128xf32>
    %c1_i32 = arith.constant 1 : i32
    %c0_34 = arith.constant 0 : index
    %c0_35 = arith.constant 0 : index
    %c0_36 = arith.constant 0 : index
    %47 = vector.load %arg3[%c0_34, %c0_35, %c0_36] : memref<2x128x128xf32, #tpu.memory_space<vmem>>, vector<1x128x128xf32>
    %48 = vector.shape_cast %47 : vector<1x128x128xf32> to vector<128x128xf32>
    %cst_37 = arith.constant dense<0.000000e+00> : vector<8x128xf32>
    %49 = tpu.matmul %34, %48, %cst_37 {dimension_numbers = #tpu.dot_dimension_numbers<[1], [0], [0], [1], [0, 0, 1, 1], [], []>} : vector<8x128xf32>, vector<128x128xf32>, vector<8x128xf32> -> vector<8x128xf32>
    %50 = arith.index_cast %c1_i32 : i32 to index
    %c0_38 = arith.constant 0 : index
    %c0_39 = arith.constant 0 : index
    %51 = vector.load %arg9[%50, %c0_38, %c0_39] : memref<8x8x128xf32, #tpu.memory_space<vmem>>, vector<1x8x128xf32>
    %52 = vector.shape_cast %51 : vector<1x8x128xf32> to vector<8x128xf32>
    %53 = arith.addf %52, %49 : vector<8x128xf32>
    %54 = math.tanh %53 : vector<8x128xf32>
    %55 = arith.subf %54, %34 : vector<8x128xf32>
    %56 = arith.mulf %55, %17 : vector<8x128xf32>
    %57 = arith.addf %34, %56 : vector<8x128xf32>
    %c1_40 = arith.constant 1 : index
    %c0_41 = arith.constant 0 : index
    %c0_42 = arith.constant 0 : index
    %58 = vector.load %arg3[%c1_40, %c0_41, %c0_42] : memref<2x128x128xf32, #tpu.memory_space<vmem>>, vector<1x128x128xf32>
    %59 = vector.shape_cast %58 : vector<1x128x128xf32> to vector<128x128xf32>
    %cst_43 = arith.constant dense<0.000000e+00> : vector<8x128xf32>
    %60 = tpu.matmul %46, %59, %cst_43 {dimension_numbers = #tpu.dot_dimension_numbers<[1], [0], [0], [1], [0, 0, 1, 1], [], []>} : vector<8x128xf32>, vector<128x128xf32>, vector<8x128xf32> -> vector<8x128xf32>
    %c0_44 = arith.constant 0 : index
    %c0_45 = arith.constant 0 : index
    %c0_46 = arith.constant 0 : index
    %61 = vector.load %arg2[%c0_44, %c0_45, %c0_46] : memref<1x128x128xf32, #tpu.memory_space<vmem>>, vector<1x128x128xf32>
    %62 = vector.shape_cast %61 : vector<1x128x128xf32> to vector<128x128xf32>
    %cst_47 = arith.constant dense<0.000000e+00> : vector<8x128xf32>
    %63 = tpu.matmul %57, %62, %cst_47 {dimension_numbers = #tpu.dot_dimension_numbers<[1], [0], [0], [1], [0, 0, 1, 1], [], []>} : vector<8x128xf32>, vector<128x128xf32>, vector<8x128xf32> -> vector<8x128xf32>
    %64 = arith.addf %63, %60 : vector<8x128xf32>
    %65 = arith.addf %64, %13 : vector<8x128xf32>
    %66 = math.tanh %65 : vector<8x128xf32>
    %67 = arith.subf %66, %46 : vector<8x128xf32>
    %68 = arith.mulf %67, %21 : vector<8x128xf32>
    %69 = arith.addf %46, %68 : vector<8x128xf32>
    %c2_i32 = arith.constant 2 : i32
    %c0_48 = arith.constant 0 : index
    %c0_49 = arith.constant 0 : index
    %c0_50 = arith.constant 0 : index
    %70 = vector.load %arg3[%c0_48, %c0_49, %c0_50] : memref<2x128x128xf32, #tpu.memory_space<vmem>>, vector<1x128x128xf32>
    %71 = vector.shape_cast %70 : vector<1x128x128xf32> to vector<128x128xf32>
    %cst_51 = arith.constant dense<0.000000e+00> : vector<8x128xf32>
    %72 = tpu.matmul %57, %71, %cst_51 {dimension_numbers = #tpu.dot_dimension_numbers<[1], [0], [0], [1], [0, 0, 1, 1], [], []>} : vector<8x128xf32>, vector<128x128xf32>, vector<8x128xf32> -> vector<8x128xf32>
    %73 = arith.index_cast %c2_i32 : i32 to index
    %c0_52 = arith.constant 0 : index
    %c0_53 = arith.constant 0 : index
    %74 = vector.load %arg9[%73, %c0_52, %c0_53] : memref<8x8x128xf32, #tpu.memory_space<vmem>>, vector<1x8x128xf32>
    %75 = vector.shape_cast %74 : vector<1x8x128xf32> to vector<8x128xf32>
    %76 = arith.addf %75, %72 : vector<8x128xf32>
    %77 = math.tanh %76 : vector<8x128xf32>
    %78 = arith.subf %77, %57 : vector<8x128xf32>
    %79 = arith.mulf %78, %17 : vector<8x128xf32>
    %80 = arith.addf %57, %79 : vector<8x128xf32>
    %c1_54 = arith.constant 1 : index
    %c0_55 = arith.constant 0 : index
    %c0_56 = arith.constant 0 : index
    %81 = vector.load %arg3[%c1_54, %c0_55, %c0_56] : memref<2x128x128xf32, #tpu.memory_space<vmem>>, vector<1x128x128xf32>
    %82 = vector.shape_cast %81 : vector<1x128x128xf32> to vector<128x128xf32>
    %cst_57 = arith.constant dense<0.000000e+00> : vector<8x128xf32>
    %83 = tpu.matmul %69, %82, %cst_57 {dimension_numbers = #tpu.dot_dimension_numbers<[1], [0], [0], [1], [0, 0, 1, 1], [], []>} : vector<8x128xf32>, vector<128x128xf32>, vector<8x128xf32> -> vector<8x128xf32>
    %c0_58 = arith.constant 0 : index
    %c0_59 = arith.constant 0 : index
    %c0_60 = arith.constant 0 : index
    %84 = vector.load %arg2[%c0_58, %c0_59, %c0_60] : memref<1x128x128xf32, #tpu.memory_space<vmem>>, vector<1x128x128xf32>
    %85 = vector.shape_cast %84 : vector<1x128x128xf32> to vector<128x128xf32>
    %cst_61 = arith.constant dense<0.000000e+00> : vector<8x128xf32>
    %86 = tpu.matmul %80, %85, %cst_61 {dimension_numbers = #tpu.dot_dimension_numbers<[1], [0], [0], [1], [0, 0, 1, 1], [], []>} : vector<8x128xf32>, vector<128x128xf32>, vector<8x128xf32> -> vector<8x128xf32>
    %87 = arith.addf %86, %83 : vector<8x128xf32>
    %88 = arith.addf %87, %13 : vector<8x128xf32>
    %89 = math.tanh %88 : vector<8x128xf32>
    %90 = arith.subf %89, %69 : vector<8x128xf32>
    %91 = arith.mulf %90, %21 : vector<8x128xf32>
    %92 = arith.addf %69, %91 : vector<8x128xf32>
    %c3_i32 = arith.constant 3 : i32
    %c0_62 = arith.constant 0 : index
    %c0_63 = arith.constant 0 : index
    %c0_64 = arith.constant 0 : index
    %93 = vector.load %arg3[%c0_62, %c0_63, %c0_64] : memref<2x128x128xf32, #tpu.memory_space<vmem>>, vector<1x128x128xf32>
    %94 = vector.shape_cast %93 : vector<1x128x128xf32> to vector<128x128xf32>
    %cst_65 = arith.constant dense<0.000000e+00> : vector<8x128xf32>
    %95 = tpu.matmul %80, %94, %cst_65 {dimension_numbers = #tpu.dot_dimension_numbers<[1], [0], [0], [1], [0, 0, 1, 1], [], []>} : vector<8x128xf32>, vector<128x128xf32>, vector<8x128xf32> -> vector<8x128xf32>
    %96 = arith.index_cast %c3_i32 : i32 to index
    %c0_66 = arith.constant 0 : index
    %c0_67 = arith.constant 0 : index
    %97 = vector.load %arg9[%96, %c0_66, %c0_67] : memref<8x8x128xf32, #tpu.memory_space<vmem>>, vector<1x8x128xf32>
    %98 = vector.shape_cast %97 : vector<1x8x128xf32> to vector<8x128xf32>
    %99 = arith.addf %98, %95 : vector<8x128xf32>
    %100 = math.tanh %99 : vector<8x128xf32>
    %101 = arith.subf %100, %80 : vector<8x128xf32>
    %102 = arith.mulf %101, %17 : vector<8x128xf32>
    %103 = arith.addf %80, %102 : vector<8x128xf32>
    %c1_68 = arith.constant 1 : index
    %c0_69 = arith.constant 0 : index
    %c0_70 = arith.constant 0 : index
    %104 = vector.load %arg3[%c1_68, %c0_69, %c0_70] : memref<2x128x128xf32, #tpu.memory_space<vmem>>, vector<1x128x128xf32>
    %105 = vector.shape_cast %104 : vector<1x128x128xf32> to vector<128x128xf32>
    %cst_71 = arith.constant dense<0.000000e+00> : vector<8x128xf32>
    %106 = tpu.matmul %92, %105, %cst_71 {dimension_numbers = #tpu.dot_dimension_numbers<[1], [0], [0], [1], [0, 0, 1, 1], [], []>} : vector<8x128xf32>, vector<128x128xf32>, vector<8x128xf32> -> vector<8x128xf32>
    %c0_72 = arith.constant 0 : index
    %c0_73 = arith.constant 0 : index
    %c0_74 = arith.constant 0 : index
    %107 = vector.load %arg2[%c0_72, %c0_73, %c0_74] : memref<1x128x128xf32, #tpu.memory_space<vmem>>, vector<1x128x128xf32>
    %108 = vector.shape_cast %107 : vector<1x128x128xf32> to vector<128x128xf32>
    %cst_75 = arith.constant dense<0.000000e+00> : vector<8x128xf32>
    %109 = tpu.matmul %103, %108, %cst_75 {dimension_numbers = #tpu.dot_dimension_numbers<[1], [0], [0], [1], [0, 0, 1, 1], [], []>} : vector<8x128xf32>, vector<128x128xf32>, vector<8x128xf32> -> vector<8x128xf32>
    %110 = arith.addf %109, %106 : vector<8x128xf32>
    %111 = arith.addf %110, %13 : vector<8x128xf32>
    %112 = math.tanh %111 : vector<8x128xf32>
    %113 = arith.subf %112, %92 : vector<8x128xf32>
    %114 = arith.mulf %113, %21 : vector<8x128xf32>
    %115 = arith.addf %92, %114 : vector<8x128xf32>
    %c4_i32 = arith.constant 4 : i32
    %c0_76 = arith.constant 0 : index
    %c0_77 = arith.constant 0 : index
    %c0_78 = arith.constant 0 : index
    %116 = vector.load %arg3[%c0_76, %c0_77, %c0_78] : memref<2x128x128xf32, #tpu.memory_space<vmem>>, vector<1x128x128xf32>
    %117 = vector.shape_cast %116 : vector<1x128x128xf32> to vector<128x128xf32>
    %cst_79 = arith.constant dense<0.000000e+00> : vector<8x128xf32>
    %118 = tpu.matmul %103, %117, %cst_79 {dimension_numbers = #tpu.dot_dimension_numbers<[1], [0], [0], [1], [0, 0, 1, 1], [], []>} : vector<8x128xf32>, vector<128x128xf32>, vector<8x128xf32> -> vector<8x128xf32>
    %119 = arith.index_cast %c4_i32 : i32 to index
    %c0_80 = arith.constant 0 : index
    %c0_81 = arith.constant 0 : index
    %120 = vector.load %arg9[%119, %c0_80, %c0_81] : memref<8x8x128xf32, #tpu.memory_space<vmem>>, vector<1x8x128xf32>
    %121 = vector.shape_cast %120 : vector<1x8x128xf32> to vector<8x128xf32>
    %122 = arith.addf %121, %118 : vector<8x128xf32>
    %123 = math.tanh %122 : vector<8x128xf32>
    %124 = arith.subf %123, %103 : vector<8x128xf32>
    %125 = arith.mulf %124, %17 : vector<8x128xf32>
    %126 = arith.addf %103, %125 : vector<8x128xf32>
    %c1_82 = arith.constant 1 : index
    %c0_83 = arith.constant 0 : index
    %c0_84 = arith.constant 0 : index
    %127 = vector.load %arg3[%c1_82, %c0_83, %c0_84] : memref<2x128x128xf32, #tpu.memory_space<vmem>>, vector<1x128x128xf32>
    %128 = vector.shape_cast %127 : vector<1x128x128xf32> to vector<128x128xf32>
    %cst_85 = arith.constant dense<0.000000e+00> : vector<8x128xf32>
    %129 = tpu.matmul %115, %128, %cst_85 {dimension_numbers = #tpu.dot_dimension_numbers<[1], [0], [0], [1], [0, 0, 1, 1], [], []>} : vector<8x128xf32>, vector<128x128xf32>, vector<8x128xf32> -> vector<8x128xf32>
    %c0_86 = arith.constant 0 : index
    %c0_87 = arith.constant 0 : index
    %c0_88 = arith.constant 0 : index
    %130 = vector.load %arg2[%c0_86, %c0_87, %c0_88] : memref<1x128x128xf32, #tpu.memory_space<vmem>>, vector<1x128x128xf32>
    %131 = vector.shape_cast %130 : vector<1x128x128xf32> to vector<128x128xf32>
    %cst_89 = arith.constant dense<0.000000e+00> : vector<8x128xf32>
    %132 = tpu.matmul %126, %131, %cst_89 {dimension_numbers = #tpu.dot_dimension_numbers<[1], [0], [0], [1], [0, 0, 1, 1], [], []>} : vector<8x128xf32>, vector<128x128xf32>, vector<8x128xf32> -> vector<8x128xf32>
    %133 = arith.addf %132, %129 : vector<8x128xf32>
    %134 = arith.addf %133, %13 : vector<8x128xf32>
    %135 = math.tanh %134 : vector<8x128xf32>
    %136 = arith.subf %135, %115 : vector<8x128xf32>
    %137 = arith.mulf %136, %21 : vector<8x128xf32>
    %138 = arith.addf %115, %137 : vector<8x128xf32>
    %c5_i32 = arith.constant 5 : i32
    %c0_90 = arith.constant 0 : index
    %c0_91 = arith.constant 0 : index
    %c0_92 = arith.constant 0 : index
    %139 = vector.load %arg3[%c0_90, %c0_91, %c0_92] : memref<2x128x128xf32, #tpu.memory_space<vmem>>, vector<1x128x128xf32>
    %140 = vector.shape_cast %139 : vector<1x128x128xf32> to vector<128x128xf32>
    %cst_93 = arith.constant dense<0.000000e+00> : vector<8x128xf32>
    %141 = tpu.matmul %126, %140, %cst_93 {dimension_numbers = #tpu.dot_dimension_numbers<[1], [0], [0], [1], [0, 0, 1, 1], [], []>} : vector<8x128xf32>, vector<128x128xf32>, vector<8x128xf32> -> vector<8x128xf32>
    %142 = arith.index_cast %c5_i32 : i32 to index
    %c0_94 = arith.constant 0 : index
    %c0_95 = arith.constant 0 : index
    %143 = vector.load %arg9[%142, %c0_94, %c0_95] : memref<8x8x128xf32, #tpu.memory_space<vmem>>, vector<1x8x128xf32>
    %144 = vector.shape_cast %143 : vector<1x8x128xf32> to vector<8x128xf32>
    %145 = arith.addf %144, %141 : vector<8x128xf32>
    %146 = math.tanh %145 : vector<8x128xf32>
    %147 = arith.subf %146, %126 : vector<8x128xf32>
    %148 = arith.mulf %147, %17 : vector<8x128xf32>
    %149 = arith.addf %126, %148 : vector<8x128xf32>
    %c1_96 = arith.constant 1 : index
    %c0_97 = arith.constant 0 : index
    %c0_98 = arith.constant 0 : index
    %150 = vector.load %arg3[%c1_96, %c0_97, %c0_98] : memref<2x128x128xf32, #tpu.memory_space<vmem>>, vector<1x128x128xf32>
    %151 = vector.shape_cast %150 : vector<1x128x128xf32> to vector<128x128xf32>
    %cst_99 = arith.constant dense<0.000000e+00> : vector<8x128xf32>
    %152 = tpu.matmul %138, %151, %cst_99 {dimension_numbers = #tpu.dot_dimension_numbers<[1], [0], [0], [1], [0, 0, 1, 1], [], []>} : vector<8x128xf32>, vector<128x128xf32>, vector<8x128xf32> -> vector<8x128xf32>
    %c0_100 = arith.constant 0 : index
    %c0_101 = arith.constant 0 : index
    %c0_102 = arith.constant 0 : index
    %153 = vector.load %arg2[%c0_100, %c0_101, %c0_102] : memref<1x128x128xf32, #tpu.memory_space<vmem>>, vector<1x128x128xf32>
    %154 = vector.shape_cast %153 : vector<1x128x128xf32> to vector<128x128xf32>
    %cst_103 = arith.constant dense<0.000000e+00> : vector<8x128xf32>
    %155 = tpu.matmul %149, %154, %cst_103 {dimension_numbers = #tpu.dot_dimension_numbers<[1], [0], [0], [1], [0, 0, 1, 1], [], []>} : vector<8x128xf32>, vector<128x128xf32>, vector<8x128xf32> -> vector<8x128xf32>
    %156 = arith.addf %155, %152 : vector<8x128xf32>
    %157 = arith.addf %156, %13 : vector<8x128xf32>
    %158 = math.tanh %157 : vector<8x128xf32>
    %159 = arith.subf %158, %138 : vector<8x128xf32>
    %160 = arith.mulf %159, %21 : vector<8x128xf32>
    %161 = arith.addf %138, %160 : vector<8x128xf32>
    %c6_i32 = arith.constant 6 : i32
    %c0_104 = arith.constant 0 : index
    %c0_105 = arith.constant 0 : index
    %c0_106 = arith.constant 0 : index
    %162 = vector.load %arg3[%c0_104, %c0_105, %c0_106] : memref<2x128x128xf32, #tpu.memory_space<vmem>>, vector<1x128x128xf32>
    %163 = vector.shape_cast %162 : vector<1x128x128xf32> to vector<128x128xf32>
    %cst_107 = arith.constant dense<0.000000e+00> : vector<8x128xf32>
    %164 = tpu.matmul %149, %163, %cst_107 {dimension_numbers = #tpu.dot_dimension_numbers<[1], [0], [0], [1], [0, 0, 1, 1], [], []>} : vector<8x128xf32>, vector<128x128xf32>, vector<8x128xf32> -> vector<8x128xf32>
    %165 = arith.index_cast %c6_i32 : i32 to index
    %c0_108 = arith.constant 0 : index
    %c0_109 = arith.constant 0 : index
    %166 = vector.load %arg9[%165, %c0_108, %c0_109] : memref<8x8x128xf32, #tpu.memory_space<vmem>>, vector<1x8x128xf32>
    %167 = vector.shape_cast %166 : vector<1x8x128xf32> to vector<8x128xf32>
    %168 = arith.addf %167, %164 : vector<8x128xf32>
    %169 = math.tanh %168 : vector<8x128xf32>
    %170 = arith.subf %169, %149 : vector<8x128xf32>
    %171 = arith.mulf %170, %17 : vector<8x128xf32>
    %172 = arith.addf %149, %171 : vector<8x128xf32>
    %c1_110 = arith.constant 1 : index
    %c0_111 = arith.constant 0 : index
    %c0_112 = arith.constant 0 : index
    %173 = vector.load %arg3[%c1_110, %c0_111, %c0_112] : memref<2x128x128xf32, #tpu.memory_space<vmem>>, vector<1x128x128xf32>
    %174 = vector.shape_cast %173 : vector<1x128x128xf32> to vector<128x128xf32>
    %cst_113 = arith.constant dense<0.000000e+00> : vector<8x128xf32>
    %175 = tpu.matmul %161, %174, %cst_113 {dimension_numbers = #tpu.dot_dimension_numbers<[1], [0], [0], [1], [0, 0, 1, 1], [], []>} : vector<8x128xf32>, vector<128x128xf32>, vector<8x128xf32> -> vector<8x128xf32>
    %c0_114 = arith.constant 0 : index
    %c0_115 = arith.constant 0 : index
    %c0_116 = arith.constant 0 : index
    %176 = vector.load %arg2[%c0_114, %c0_115, %c0_116] : memref<1x128x128xf32, #tpu.memory_space<vmem>>, vector<1x128x128xf32>
    %177 = vector.shape_cast %176 : vector<1x128x128xf32> to vector<128x128xf32>
    %cst_117 = arith.constant dense<0.000000e+00> : vector<8x128xf32>
    %178 = tpu.matmul %172, %177, %cst_117 {dimension_numbers = #tpu.dot_dimension_numbers<[1], [0], [0], [1], [0, 0, 1, 1], [], []>} : vector<8x128xf32>, vector<128x128xf32>, vector<8x128xf32> -> vector<8x128xf32>
    %179 = arith.addf %178, %175 : vector<8x128xf32>
    %180 = arith.addf %179, %13 : vector<8x128xf32>
    %181 = math.tanh %180 : vector<8x128xf32>
    %182 = arith.subf %181, %161 : vector<8x128xf32>
    %183 = arith.mulf %182, %21 : vector<8x128xf32>
    %184 = arith.addf %161, %183 : vector<8x128xf32>
    %c7_i32 = arith.constant 7 : i32
    %c0_118 = arith.constant 0 : index
    %c0_119 = arith.constant 0 : index
    %c0_120 = arith.constant 0 : index
    %185 = vector.load %arg3[%c0_118, %c0_119, %c0_120] : memref<2x128x128xf32, #tpu.memory_space<vmem>>, vector<1x128x128xf32>
    %186 = vector.shape_cast %185 : vector<1x128x128xf32> to vector<128x128xf32>
    %cst_121 = arith.constant dense<0.000000e+00> : vector<8x128xf32>
    %187 = tpu.matmul %172, %186, %cst_121 {dimension_numbers = #tpu.dot_dimension_numbers<[1], [0], [0], [1], [0, 0, 1, 1], [], []>} : vector<8x128xf32>, vector<128x128xf32>, vector<8x128xf32> -> vector<8x128xf32>
    %188 = arith.index_cast %c7_i32 : i32 to index
    %c0_122 = arith.constant 0 : index
    %c0_123 = arith.constant 0 : index
    %189 = vector.load %arg9[%188, %c0_122, %c0_123] : memref<8x8x128xf32, #tpu.memory_space<vmem>>, vector<1x8x128xf32>
    %190 = vector.shape_cast %189 : vector<1x8x128xf32> to vector<8x128xf32>
    %191 = arith.addf %190, %187 : vector<8x128xf32>
    %192 = math.tanh %191 : vector<8x128xf32>
    %193 = arith.subf %192, %172 : vector<8x128xf32>
    %194 = arith.mulf %193, %17 : vector<8x128xf32>
    %195 = arith.addf %172, %194 : vector<8x128xf32>
    %c1_124 = arith.constant 1 : index
    %c0_125 = arith.constant 0 : index
    %c0_126 = arith.constant 0 : index
    %196 = vector.load %arg3[%c1_124, %c0_125, %c0_126] : memref<2x128x128xf32, #tpu.memory_space<vmem>>, vector<1x128x128xf32>
    %197 = vector.shape_cast %196 : vector<1x128x128xf32> to vector<128x128xf32>
    %cst_127 = arith.constant dense<0.000000e+00> : vector<8x128xf32>
    %198 = tpu.matmul %184, %197, %cst_127 {dimension_numbers = #tpu.dot_dimension_numbers<[1], [0], [0], [1], [0, 0, 1, 1], [], []>} : vector<8x128xf32>, vector<128x128xf32>, vector<8x128xf32> -> vector<8x128xf32>
    %c0_128 = arith.constant 0 : index
    %c0_129 = arith.constant 0 : index
    %c0_130 = arith.constant 0 : index
    %199 = vector.load %arg2[%c0_128, %c0_129, %c0_130] : memref<1x128x128xf32, #tpu.memory_space<vmem>>, vector<1x128x128xf32>
    %200 = vector.shape_cast %199 : vector<1x128x128xf32> to vector<128x128xf32>
    %cst_131 = arith.constant dense<0.000000e+00> : vector<8x128xf32>
    %201 = tpu.matmul %195, %200, %cst_131 {dimension_numbers = #tpu.dot_dimension_numbers<[1], [0], [0], [1], [0, 0, 1, 1], [], []>} : vector<8x128xf32>, vector<128x128xf32>, vector<8x128xf32> -> vector<8x128xf32>
    %202 = arith.addf %201, %198 : vector<8x128xf32>
    %203 = arith.addf %202, %13 : vector<8x128xf32>
    %204 = math.tanh %203 : vector<8x128xf32>
    %205 = arith.subf %204, %184 : vector<8x128xf32>
    %206 = arith.mulf %205, %21 : vector<8x128xf32>
    %207 = arith.addf %184, %206 : vector<8x128xf32>
    %c8_i32 = arith.constant 8 : i32
    %c0_132 = arith.constant 0 : index
    %c0_133 = arith.constant 0 : index
    %208 = vector.load %arg6[%c0_132, %c0_133] : memref<128x128xf32, #tpu.memory_space<vmem>>, vector<128x128xf32>
    %cst_134 = arith.constant dense<0.000000e+00> : vector<8x128xf32>
    %209 = tpu.matmul %207, %208, %cst_134 {dimension_numbers = #tpu.dot_dimension_numbers<[1], [0], [0], [1], [0, 0, 1, 1], [], []>} : vector<8x128xf32>, vector<128x128xf32>, vector<8x128xf32> -> vector<8x128xf32>
    %c0_135 = arith.constant 0 : index
    %c0_136 = arith.constant 0 : index
    %210 = vector.load %arg7[%c0_135, %c0_136] : memref<1x128xf32, #tpu.memory_space<vmem>>, vector<1x128xf32>
    %211 = vector.broadcast %210 : vector<1x128xf32> to vector<8x128xf32>
    %212 = arith.addf %209, %211 : vector<8x128xf32>
    %c0_137 = arith.constant 0 : index
    %c0_138 = arith.constant 0 : index
    %213 = vector.load %arg8[%c0_137, %c0_138] : memref<8x128xf32, #tpu.memory_space<vmem>>, vector<8x128xf32>
    tpu.vector_store %arg8[%c0_137, %c0_138], %212 {strides = array<i32>} : memref<8x128xf32, #tpu.memory_space<vmem>>, vector<8x128xf32>,
    return
  }
}

</mosaic_0001>

<bundles_post_ra>
// kernel: liquid_neural_network.1
= control target key start
LH: loop header
LB: loop body
LE: loop exit
PB: predicated region body
PF: predicated region fallthrough
CT: control target
= control target key end

     0   :  { %v856_v51 = vmov 0.0   ;;  %s1797_s1 = inlined_call_operand.vmem [shape: f32[128,128], index: 1, kind: input, shape index: {}]   ;;  %s1798_s3 = inlined_call_operand.vmem [shape: f32[2,128,128], index: 3, kind: input, shape index: {}]   ;;  %s1799_s2 = inlined_call_operand.vmem [shape: f32[1,128,128], index: 2, kind: input, shape index: {}]   ;;  %s1800_s4 = inlined_call_operand.vmem [shape: f32[2,1,128], index: 4, kind: input, shape index: {}]   ;;  %s1801_s0 = inlined_call_operand.vmem [shape: f32[8,8,128], index: 0, kind: input, shape index: {}]   ;;  %s1802_s5 = inlined_call_operand.vmem [shape: f32[2,1,128], index: 5, kind: input, shape index: {}]   ;;  %s1803_s7 = inlined_call_operand.vmem [shape: f32[1,128], index: 7, kind: input, shape index: {}]   ;;  %s1804_s6 = inlined_call_operand.vmem [shape: f32[128,128], index: 6, kind: input, shape index: {}]   ;;  %s1805_s8 = inlined_call_operand.vmem [shape: f32[8,128], index: 8, kind: output, shape index: {}]  }
   0x1   :  { %v52_v0 = vld [vmem:[%s1797_s1 + $0x78] sm:$0xff]  ;;  %v51_v1 = vld [vmem:[%s1797_s1 + $0x70] sm:$0xff]  ;;  %v50_v4 = vld [vmem:[%s1797_s1 + $0x68] sm:$0xff] }
   0x2   :  { %v911_v2 = vld [vmem:[%s1798_s3 + $0x78] sm:$0xff]  ;;  %57 = vmatpush.msra.mxu0 %v52_v0  ;;  %v917_v3 = vld [vmem:[%s1798_s3 + $0x70] sm:$0xff]  ;;  %v925_v5 = vld [vmem:[%s1798_s3 + $0x68] sm:$0xff] }
   0x3   :  { %136 = vmatpush.msra.mxu1 %v911_v2  ;;  %v49_v6 = vld [vmem:[%s1797_s1 + $0x60] sm:$0xff]  ;;  %v48_v8 = vld [vmem:[%s1797_s1 + $0x58] sm:$0xff]  ;;  %v47_v10 = vld [vmem:[%s1797_s1 + $0x50] sm:$0xff] }
   0x4   :  { %58 = vmatpush.msra.mxu0 %v51_v1  ;;  %v934_v7 = vld [vmem:[%s1798_s3 + $0x60] sm:$0xff]  ;;  %v943_v9 = vld [vmem:[%s1798_s3 + $0x58] sm:$0xff]  ;;  %v952_v11 = vld [vmem:[%s1798_s3 + $0x50] sm:$0xff] }
   0x5   :  { %137 = vmatpush.msra.mxu1 %v917_v3  ;;  %v46_v12 = vld [vmem:[%s1797_s1 + $0x48] sm:$0xff]  ;;  %v967_v14 = vld [vmem:[%s1798_s3 + $0xf8] sm:$0xff]  ;;  %v977_v16 = vld [vmem:[%s1798_s3 + $0xf0] sm:$0xff] }
   0x6   :  { %59 = vmatpush.msra.mxu0 %v50_v4  ;;  %v961_v13 = vld [vmem:[%s1798_s3 + $0x48] sm:$0xff]  ;;  %v972_v15 = vld [vmem:[%s1799_s2 + $0x78] sm:$0xff]  ;;  %v45_v17 = vld [vmem:[%s1797_s1 + $0x40] sm:$0xff]  ;;  %178 = vmatpush.msra.mxu2 %v967_v14 }
   0x7   :  { %138 = vmatpush.msra.mxu1 %v925_v5  ;;  %v985_v18 = vld [vmem:[%s1798_s3 + $0x40] sm:$0xff]  ;;  %214 = vmatpush.msra.mxu3 %v972_v15  ;;  %v992_v19 = vld [vmem:[%s1799_s2 + $0x70] sm:$0xff]  ;;  %v998_v20 = vld [vmem:[%s1798_s3 + $0xe8] sm:$0xff] }
   0x8   :  { %60 = vmatpush.msra.mxu0 %v49_v6  ;;  %v1003_v21 = vld [vmem:[%s1799_s2 + $0x68] sm:$0xff]  ;;  %v44_v22 = vld [vmem:[%s1797_s1 + $0x38] sm:$0xff]  ;;  %179 = vmatpush.msra.mxu2 %v977_v16  ;;  %v1019_v24 = vld [vmem:[%s1798_s3 + $0xe0] sm:$0xff] }
   0x9   :  { %139 = vmatpush.msra.mxu1 %v934_v7  ;;  %v1011_v23 = vld [vmem:[%s1798_s3 + $0x38] sm:$0xff]  ;;  %215 = vmatpush.msra.mxu3 %v992_v19  ;;  %v1024_v25 = vld [vmem:[%s1799_s2 + $0x60] sm:$0xff]  ;;  %v43_v26 = vld [vmem:[%s1797_s1 + $0x30] sm:$0xff] }
   0xa   :  { %61 = vmatpush.msra.mxu0 %v48_v8  ;;  %v1032_v27 = vld [vmem:[%s1798_s3 + $0x30] sm:$0xff]  ;;  %180 = vmatpush.msra.mxu2 %v998_v20  ;;  %v1039_v28 = vld [vmem:[%s1798_s3 + $0xd8] sm:$0xff]  ;;  %v42_v30 = vld [vmem:[%s1797_s1 + $0x28] sm:$0xff] }
   0xb   :  { %140 = vmatpush.msra.mxu1 %v943_v9  ;;  %216 = vmatpush.msra.mxu3 %v1003_v21  ;;  %v1045_v29 = vld [vmem:[%s1799_s2 + $0x58] sm:$0xff]  ;;  %v1053_v31 = vld [vmem:[%s1798_s3 + $0x28] sm:$0xff]  ;;  %v1061_v32 = vld [vmem:[%s1798_s3 + $0xd0] sm:$0xff] }
   0xc   :  { %62 = vmatpush.msra.mxu0 %v47_v10  ;;  %181 = vmatpush.msra.mxu2 %v1019_v24  ;;  %v1066_v33 = vld [vmem:[%s1799_s2 + $0x50] sm:$0xff]  ;;  %v41_v34 = vld [vmem:[%s1797_s1 + $0x20] sm:$0xff]  ;;  %v1082_v36 = vld [vmem:[%s1798_s3 + $0xc8] sm:$0xff] }
   0xd   :  { %141 = vmatpush.msra.mxu1 %v952_v11  ;;  %217 = vmatpush.msra.mxu3 %v1024_v25  ;;  %v1074_v35 = vld [vmem:[%s1798_s3 + $0x20] sm:$0xff]  ;;  %v1087_v37 = vld [vmem:[%s1799_s2 + $0x48] sm:$0xff]  ;;  %v40_v38 = vld [vmem:[%s1797_s1 + $0x18] sm:$0xff] }
   0xe   :  { %63 = vmatpush.msra.mxu0 %v46_v12  ;;  %182 = vmatpush.msra.mxu2 %v1039_v28  ;;  %v1095_v39 = vld [vmem:[%s1798_s3 + $0x18] sm:$0xff]  ;;  %v1103_v40 = vld [vmem:[%s1798_s3 + $0xc0] sm:$0xff]  ;;  %v39_v42 = vld [vmem:[%s1797_s1 + $0x10] sm:$0xff] }
   0xf   :  { %142 = vmatpush.msra.mxu1 %v961_v13  ;;  %218 = vmatpush.msra.mxu3 %v1045_v29  ;;  %1814 = vst [vmem:[#allocation3_spill] sm:$0xff] %v1095_v39  ;;  %v1108_v41 = vld [vmem:[%s1799_s2 + $0x40] sm:$0xff]  ;;  %v1116_v43 = vld [vmem:[%s1798_s3 + $0x10] sm:$0xff]  ;;  %v1124_v44 = vld [vmem:[%s1798_s3 + $0xb8] sm:$0xff] }
  0x10   :  { %64 = vmatpush.msra.mxu0 %v45_v17  ;;  %183 = vmatpush.msra.mxu2 %v1061_v32  ;;  %1815 = vst [vmem:[#allocation4_spill] sm:$0xff] %v1116_v43  ;;  %v1129_v45 = vld [vmem:[%s1799_s2 + $0x38] sm:$0xff]  ;;  %v38_v46 = vld [vmem:[%s1797_s1 + $0x8] sm:$0xff]  ;;  %v37_v48 = vld [vmem:[%s1797_s1] sm:$0xff] }
  0x11   :  { %143 = vmatpush.msra.mxu1 %v985_v18  ;;  %219 = vmatpush.msra.mxu3 %v1066_v33  ;;  %v1137_v47 = vld [vmem:[%s1798_s3 + $0x8] sm:$0xff]  ;;  %v1148_v49 = vld [vmem:[%s1798_s3] sm:$0xff]  ;;  %v1211_v52 = vld [vmem:[%s1798_s3 + $0xb0] sm:$0xff] }
  0x12   :  { %65 = vmatpush.msra.mxu0 %v44_v22  ;;  %184 = vmatpush.msra.mxu2 %v1082_v36  ;;  %1816 = vst [vmem:[#allocation5_spill] sm:$0xff] %v1137_v47  ;;  %v29_v50 = vld [vmem:[%s1801_s0] sm:$0xff]  ;;  %v1216_v53 = vld [vmem:[%s1799_s2 + $0x30] sm:$0xff]  ;;  %v1223_v54 = vld [vmem:[%s1798_s3 + $0xa8] sm:$0xff] }
  0x13   :  { %144 = vmatpush.msra.mxu1 %v1011_v23  ;;  %220 = vmatpush.msra.mxu3 %v1087_v37  ;;  %1817 = vst [vmem:[#allocation6_spill] sm:$0xff] %v1148_v49  ;;  %v1228_v55 = vld [vmem:[%s1799_s2 + $0x28] sm:$0xff]  ;;  %v1237_v56 = vld [vmem:[%s1798_s3 + $0xa0] sm:$0xff]  ;;  %v1251_v58 = vld [vmem:[%s1798_s3 + $0x98] sm:$0xff] }
  0x14   :  { %66 = vmatpush.msra.mxu0 %v43_v26  ;;  %185 = vmatpush.msra.mxu2 %v1103_v40  ;;  %v1242_v57 = vld [vmem:[%s1799_s2 + $0x20] sm:$0xff]  ;;  %v1256_v59 = vld [vmem:[%s1799_s2 + $0x18] sm:$0xff]  ;;  %v1261_v60 = vld [vmem:[%s1798_s3 + $0x90] sm:$0xff] }
  0x15   :  { %145 = vmatpush.msra.mxu1 %v1032_v27  ;;  %221 = vmatpush.msra.mxu3 %v1108_v41  ;;  %v1266_v61 = vld [vmem:[%s1799_s2 + $0x10] sm:$0xff]  ;;  %v30_v62 = vld [vmem:[%s1801_s0 + $0x8] sm:$0xff]  ;;  %v1291_v1 = vld [vmem:[%s1798_s3 + $0x80] sm:$0xff] }
  0x16   :  { %67 = vmatpush.msra.mxu0 %v42_v30  ;;  %186 = vmatpush.msra.mxu2 %v1124_v44  ;;  %v1278_v63 = vld [vmem:[%s1798_s3 + $0x88] sm:$0xff]  ;;  %v1296_v4 = vld [vmem:[%s1799_s2] sm:$0xff]  ;;  %v31_v6 = vld [vmem:[%s1801_s0 + $0x10] sm:$0xff] }
  0x17   :  { %146 = vmatpush.msra.mxu1 %v1053_v31  ;;  %222 = vmatpush.msra.mxu3 %v1129_v45  ;;  %v1283_v0 = vld [vmem:[%s1799_s2 + $0x8] sm:$0xff]  ;;  %v32_v8 = vld [vmem:[%s1801_s0 + $0x18] sm:$0xff]  ;;  %v1334_v10 = vld [vmem:[%s1800_s4] ss:$0 sm:$0xff] }
  0x18   :  { %68 = vmatpush.msra.mxu0 %v41_v34  ;;  %187 = vmatpush.msra.mxu2 %v1211_v52  ;;  %v33_v12 = vld [vmem:[%s1801_s0 + $0x20] sm:$0xff]  ;;  %v34_v34 = vld [vmem:[%s1801_s0 + $0x28] sm:$0xff] }
  0x19   :  { %147 = vmatpush.msra.mxu1 %v1074_v35  ;;  %223 = vmatpush.msra.mxu3 %v1216_v53 }
  0x1a   :  { %69 = vmatpush.msra.mxu0 %v40_v38  ;;  %188 = vmatpush.msra.mxu2 %v1223_v54  ;;  %v1357_v38 = vld [vmem:[%s1802_s5] ss:$0 sm:$0xff] }
  0x1b   :  { %148 = vmatpush.msra.mxu1 %v1095_v39  ;;  %224 = vmatpush.msra.mxu3 %v1228_v55 }
  0x1c   :  { %70 = vmatpush.msra.mxu0 %v39_v42  ;;  %189 = vmatpush.msra.mxu2 %v1237_v56 }
  0x1d   :  { %149 = vmatpush.msra.mxu1 %v1116_v43  ;;  %225 = vmatpush.msra.mxu3 %v1242_v57 }
  0x1e   :  { %71 = vmatpush.msra.mxu0 %v38_v46  ;;  %190 = vmatpush.msra.mxu2 %v1251_v58 }
  0x1f   :  { %150 = vmatpush.msra.mxu1 %v1137_v47  ;;  %226 = vmatpush.msra.mxu3 %v1256_v59 }
  0x20   :  { %72 = vmatpush.msra.mxu0 %v37_v48  ;;  %191 = vmatpush.msra.mxu2 %v1261_v60  ;;  %v35_v48 = vld [vmem:[%s1801_s0 + $0x30] sm:$0xff] }
  0x21   :  { %151 = vmatpush.msra.mxu1 %v1148_v49  ;;  %73 = vmatmul.f32.vlgmr.msra.gmra.mxu0 %v29_v50  ;;  %v36_v50 = vld [vmem:[%s1801_s0 + $0x38] sm:$0xff] }
  0x22   :  { %152 = vmatmul.f32.vlgmr.msra.gmra.mxu1 %v856_v51  ;;  %310 = vmatpush.msrb.mxu0 %v911_v2 }
  0x23   :  { %238 = vmatpush.msrb.mxu1 %v911_v2  ;;  %227 = vmatpush.msra.mxu3 %v1266_v61 }
  0x24   :  { %311 = vmatpush.msrb.mxu0 %v917_v3  ;;  %192 = vmatpush.msra.mxu2 %v1278_v63 }
  0x25   :  { %239 = vmatpush.msrb.mxu1 %v917_v3  ;;  %228 = vmatpush.msra.mxu3 %v1283_v0 }
  0x26   :  { %312 = vmatpush.msrb.mxu0 %v925_v5  ;;  %193 = vmatpush.msra.mxu2 %v1291_v1 }
  0x27   :  { %240 = vmatpush.msrb.mxu1 %v925_v5  ;;  %229 = vmatpush.msra.mxu3 %v1296_v4 }
  0x28   :  { %313 = vmatpush.msrb.mxu0 %v934_v7  ;;  %194 = vmatmul.f32.vlgmr.msra.gmra.mxu2 %v856_v51 }
  0x29   :  { %241 = vmatpush.msrb.mxu1 %v934_v7  ;;  %76 = vmatmul.f32.gmra.mxu0 %v30_v62 }
  0x2a   :  { %314 = vmatpush.msrb.mxu0 %v943_v9  ;;  %285 = vmatpush.msrb.mxu3 %v972_v15 }
  0x2b   :  { %242 = vmatpush.msrb.mxu1 %v943_v9  ;;  %265 = vmatpush.msrb.mxu2 %v967_v14 }
  0x2c   :  { %315 = vmatpush.msrb.mxu0 %v952_v11  ;;  %286 = vmatpush.msrb.mxu3 %v992_v19 }
  0x2d   :  { %243 = vmatpush.msrb.mxu1 %v952_v11  ;;  %266 = vmatpush.msrb.mxu2 %v977_v16 }
  0x2e   :  { %316 = vmatpush.msrb.mxu0 %v961_v13  ;;  %287 = vmatpush.msrb.mxu3 %v1003_v21 }
  0x2f   :  { %244 = vmatpush.msrb.mxu1 %v961_v13  ;;  %267 = vmatpush.msrb.mxu2 %v998_v20 }
  0x30   :  { %317 = vmatpush.msrb.mxu0 %v985_v18  ;;  %288 = vmatpush.msrb.mxu3 %v1024_v25 }
  0x31   :  { %245 = vmatpush.msrb.mxu1 %v985_v18  ;;  %79 = vmatmul.f32.gmra.mxu0 %v31_v6 }
  0x32   :  { %318 = vmatpush.msrb.mxu0 %v1011_v23  ;;  %268 = vmatpush.msrb.mxu2 %v1019_v24 }
  0x33   :  { %246 = vmatpush.msrb.mxu1 %v1011_v23  ;;  %289 = vmatpush.msrb.mxu3 %v1045_v29 }
  0x34   :  { %319 = vmatpush.msrb.mxu0 %v1032_v27  ;;  %269 = vmatpush.msrb.mxu2 %v1039_v28 }
  0x35   :  { %247 = vmatpush.msrb.mxu1 %v1032_v27  ;;  %290 = vmatpush.msrb.mxu3 %v1066_v33 }
  0x36   :  { %320 = vmatpush.msrb.mxu0 %v1053_v31  ;;  %270 = vmatpush.msrb.mxu2 %v1061_v32 }
  0x37   :  { %248 = vmatpush.msrb.mxu1 %v1053_v31  ;;  %291 = vmatpush.msrb.mxu3 %v1087_v37 }
  0x38   :  { %321 = vmatpush.msrb.mxu0 %v1074_v35  ;;  %271 = vmatpush.msrb.mxu2 %v1082_v36 }
  0x39   :  { %249 = vmatpush.msrb.mxu1 %v1074_v35  ;;  %82 = vmatmul.f32.gmra.mxu0 %v32_v8 }
  0x3a   :  { %322 = vmatpush.msrb.mxu0 %v1095_v39  ;;  %292 = vmatpush.msrb.mxu3 %v1108_v41 }
  0x3b   :  { %250 = vmatpush.msrb.mxu1 %v1095_v39  ;;  %272 = vmatpush.msrb.mxu2 %v1103_v40 }
  0x3c   :  { %323 = vmatpush.msrb.mxu0 %v1116_v43  ;;  %293 = vmatpush.msrb.mxu3 %v1129_v45 }
  0x3d   :  { %251 = vmatpush.msrb.mxu1 %v1116_v43  ;;  %273 = vmatpush.msrb.mxu2 %v1124_v44 }
  0x3e   :  { %324 = vmatpush.msrb.mxu0 %v1137_v47  ;;  %294 = vmatpush.msrb.mxu3 %v1216_v53 }
  0x3f   :  { %252 = vmatpush.msrb.mxu1 %v1137_v47  ;;  %274 = vmatpush.msrb.mxu2 %v1211_v52 }
  0x40   :  { %325 = vmatpush.msrb.mxu0 %v1148_v49  ;;  %295 = vmatpush.msrb.mxu3 %v1228_v55 }
  0x41   :  { %253 = vmatpush.msrb.mxu1 %v1148_v49  ;;  %85 = vmatmul.f32.gmra.mxu0 %v33_v12 }
  0x42   :  { %409 = vmatpush.msra.mxu0 %v967_v14  ;;  %275 = vmatpush.msrb.mxu2 %v1223_v54 }
  0x43   :  { %337 = vmatpush.msra.mxu1 %v967_v14  ;;  %296 = vmatpush.msrb.mxu3 %v1242_v57 }
  0x44   :  { %410 = vmatpush.msra.mxu0 %v977_v16  ;;  %276 = vmatpush.msrb.mxu2 %v1237_v56 }
  0x45   :  { %338 = vmatpush.msra.mxu1 %v977_v16  ;;  %297 = vmatpush.msrb.mxu3 %v1256_v59 }
  0x46   :  { %411 = vmatpush.msra.mxu0 %v998_v20  ;;  %277 = vmatpush.msrb.mxu2 %v1251_v58 }
  0x47   :  { %339 = vmatpush.msra.mxu1 %v998_v20  ;;  %298 = vmatpush.msrb.mxu3 %v1266_v61 }
  0x48   :  { %412 = vmatpush.msra.mxu0 %v1019_v24  ;;  %278 = vmatpush.msrb.mxu2 %v1261_v60 }
  0x49   :  { %340 = vmatpush.msra.mxu1 %v1019_v24  ;;  %88 = vmatmul.f32.gmra.mxu0 %v34_v34 }
  0x4a   :  { %413 = vmatpush.msra.mxu0 %v1039_v28  ;;  %299 = vmatpush.msrb.mxu3 %v1283_v0 }
  0x4b   :  { %341 = vmatpush.msra.mxu1 %v1039_v28  ;;  %279 = vmatpush.msrb.mxu2 %v1278_v63 }
  0x4c   :  { %414 = vmatpush.msra.mxu0 %v1061_v32  ;;  %300 = vmatpush.msrb.mxu3 %v1296_v4 }
  0x4d   :  { %342 = vmatpush.msra.mxu1 %v1061_v32  ;;  %280 = vmatpush.msrb.mxu2 %v1291_v1 }
  0x4e   :  { %415 = vmatpush.msra.mxu0 %v1082_v36 }
  0x4f   :  { %343 = vmatpush.msra.mxu1 %v1082_v36  ;;  %357 = vmatpush.msra.mxu2 %v972_v15 }
  0x50   :  { %416 = vmatpush.msra.mxu0 %v1103_v40 }
  0x51   :  { %344 = vmatpush.msra.mxu1 %v1103_v40  ;;  %358 = vmatpush.msra.mxu2 %v992_v19 }
  0x52   :  { %417 = vmatpush.msra.mxu0 %v1124_v44 }
  0x53   :  { %345 = vmatpush.msra.mxu1 %v1124_v44  ;;  %359 = vmatpush.msra.mxu2 %v1003_v21 }
  0x54   :  { %418 = vmatpush.msra.mxu0 %v1211_v52 }
  0x55   :  { %346 = vmatpush.msra.mxu1 %v1211_v52  ;;  %360 = vmatpush.msra.mxu2 %v1024_v25 }
  0x56   :  { %419 = vmatpush.msra.mxu0 %v1223_v54 }
  0x57   :  { %347 = vmatpush.msra.mxu1 %v1223_v54  ;;  %361 = vmatpush.msra.mxu2 %v1045_v29 }
  0x58   :  { %420 = vmatpush.msra.mxu0 %v1237_v56 }
  0x59   :  { %348 = vmatpush.msra.mxu1 %v1237_v56  ;;  %362 = vmatpush.msra.mxu2 %v1066_v33 }
  0x5a   :  { %421 = vmatpush.msra.mxu0 %v1251_v58 }
  0x5b   :  { %349 = vmatpush.msra.mxu1 %v1251_v58  ;;  %363 = vmatpush.msra.mxu2 %v1087_v37 }
  0x5c   :  { %422 = vmatpush.msra.mxu0 %v1261_v60 }
  0x5d   :  { %350 = vmatpush.msra.mxu1 %v1261_v60  ;;  %364 = vmatpush.msra.mxu2 %v1108_v41 }
  0x5e   :  { %423 = vmatpush.msra.mxu0 %v1278_v63 }
  0x5f   :  { %351 = vmatpush.msra.mxu1 %v1278_v63  ;;  %365 = vmatpush.msra.mxu2 %v1129_v45 }
  0x60   :  { %424 = vmatpush.msra.mxu0 %v1291_v1 }
  0x61   :  { %352 = vmatpush.msra.mxu1 %v1291_v1  ;;  %366 = vmatpush.msra.mxu2 %v1216_v53 }
  0x62   :  { %91 = vmatmul.f32.gmra.mxu0 %v35_v48 }
  0x63   :  { %367 = vmatpush.msra.mxu2 %v1228_v55 }
  0x65   :  { %368 = vmatpush.msra.mxu2 %v1242_v57 }
  0x67   :  { %369 = vmatpush.msra.mxu2 %v1256_v59 }
  0x69   :  { %370 = vmatpush.msra.mxu2 %v1266_v61 }
  0x6a   :  { %94 = vmatmul.f32.gmra.mxu0 %v36_v50 }
  0x6b   :  { %371 = vmatpush.msra.mxu2 %v1283_v0 }
  0x6d   :  { %372 = vmatpush.msra.mxu2 %v1296_v4 }
  0x9e   :  { %v74_v17 = vpop.f32.mrf.mxu0 }
  0x9f   :  { %v153_v22 = vpop.f32.mrf.mxu1  ;;  %v75_v26 = vadd.f32 %v1334_v10, %v74_v17  ;;  %v1428_v17 = vld [vmem:[%s1800_s4 + $0x1] ss:$0 sm:$0xff] }
  0xa1   :  { %v157_v30 = vadd.f32 %v153_v22, %v75_v26 }
  0xa3   :  { %811 = vtanh.f32 %v157_v30 }
  0xa6   :  { %v77_v51 = vpop.f32.mrf.mxu0 }
  0xa7   :  { %v78_v62 = vadd.f32 %v1334_v10, %v77_v51  ;;  %v1439_v51 = vld [vmem:[%s1802_s5 + $0x1] ss:$0 sm:$0xff] }
  0xa9   :  { %v812_v42 = vpop.eup %811 }
  0xaa   :  { %v1364_v46 = vmul.f32 %v812_v42, %v1357_v38 }
  0xab   :  { %v195_v12 = vpop.f32.mrf.mxu2 }
  0xac   :  { %230 = vmatmul.f32.vlgmr.msra.gmra.mxu3 %v1364_v46  ;;  %254 = vmatmul.f32.vlgmr.msrb.gmra.mxu1 %v1364_v46 }
  0xad   :  { %382 = vmatpush.msra.mxu3 %v911_v2  ;;  %429 = vmatpush.msrb.mxu1 %v972_v15 }
  0xaf   :  { %383 = vmatpush.msra.mxu3 %v917_v3  ;;  %430 = vmatpush.msrb.mxu1 %v992_v19 }
  0xb1   :  { %384 = vmatpush.msra.mxu3 %v925_v5  ;;  %431 = vmatpush.msrb.mxu1 %v1003_v21 }
  0xb3   :  { %385 = vmatpush.msra.mxu3 %v934_v7  ;;  %432 = vmatpush.msrb.mxu1 %v1024_v25 }
  0xb5   :  { %386 = vmatpush.msra.mxu3 %v943_v9  ;;  %433 = vmatpush.msrb.mxu1 %v1045_v29 }
  0xb7   :  { %387 = vmatpush.msra.mxu3 %v952_v11  ;;  %434 = vmatpush.msrb.mxu1 %v1066_v33 }
  0xb9   :  { %388 = vmatpush.msra.mxu3 %v961_v13  ;;  %435 = vmatpush.msrb.mxu1 %v1087_v37 }
  0xbb   :  { %389 = vmatpush.msra.mxu3 %v985_v18  ;;  %436 = vmatpush.msrb.mxu1 %v1108_v41 }
  0xbd   :  { %390 = vmatpush.msra.mxu3 %v1011_v23  ;;  %437 = vmatpush.msrb.mxu1 %v1129_v45 }
  0xbf   :  { %391 = vmatpush.msra.mxu3 %v1032_v27  ;;  %438 = vmatpush.msrb.mxu1 %v1216_v53 }
  0xc1   :  { %392 = vmatpush.msra.mxu3 %v1053_v31  ;;  %439 = vmatpush.msrb.mxu1 %v1228_v55 }
  0xc3   :  { %393 = vmatpush.msra.mxu3 %v1074_v35  ;;  %440 = vmatpush.msrb.mxu1 %v1242_v57 }
  0xc5   :  { %394 = vmatpush.msra.mxu3 %v1095_v39  ;;  %441 = vmatpush.msrb.mxu1 %v1256_v59 }
  0xc7   :  { %395 = vmatpush.msra.mxu3 %v1116_v43  ;;  %442 = vmatpush.msrb.mxu1 %v1266_v61 }
  0xc9   :  { %396 = vmatpush.msra.mxu3 %v1137_v47  ;;  %443 = vmatpush.msrb.mxu1 %v1283_v0 }
  0xcb   :  { %397 = vmatpush.msra.mxu3 %v1148_v49  ;;  %444 = vmatpush.msrb.mxu1 %v1296_v4 }
 0x129   :  { %v255_v6 = vpop.f32.mrf.mxu1 }
 0x12a   :  { %v260_v8 = vadd.f32 %v255_v6, %v78_v62 }
 0x12c   :  { %813 = vtanh.f32 %v260_v8 }
 0x12f   :  { %v231_v22 = vpop.f32.mrf.mxu3 }
 0x130   :  { %v232_v26 = vadd.f32 %v231_v22, %v195_v12 }
 0x132   :  { %v814_v30 = vpop.eup %813  ;;  %v234_v34 = vadd.f32 %v1428_v17, %v232_v26 }
 0x133   :  { %v262_v42 = vsub.f32 %v814_v30, %v1364_v46 }
 0x134   :  { %815 = vtanh.f32 %v234_v34 }
 0x135   :  { %v263_v48 = vmul.f32 %v1357_v38, %v262_v42 }
 0x137   :  { %v1434_v50 = vadd.f32 %v263_v48, %v1364_v46  ;;  %v80_v46 = vpop.f32.mrf.mxu0 }
 0x138   :  { %v81_v34 = vadd.f32 %v1334_v10, %v80_v46  ;;  %v1825_v46 = vld [vmem:[#allocation5_spill] sm:$0xff] }
 0x139   :  { %301 = vmatmul.f32.vlgmr.msrb.gmra.mxu3 %v1434_v50  ;;  %326 = vmatmul.f32.vlgmr.msrb.gmra.mxu0 %v1434_v50 }
 0x13a   :  { %v816_v62 = vpop.eup %815  ;;  %501 = vmatpush.msrb.mxu0 %v972_v15  ;;  %481 = vmatpush.msrb.mxu3 %v967_v14 }
 0x13b   :  { %v1446_v6 = vmul.f32 %v816_v62, %v1439_v51 }
 0x13c   :  { %502 = vmatpush.msrb.mxu0 %v992_v19  ;;  %482 = vmatpush.msrb.mxu3 %v977_v16 }
 0x13d   :  { %281 = vmatmul.f32.vlgmr.msrb.gmra.mxu2 %v1446_v6 }
 0x13e   :  { %454 = vmatpush.msrb.mxu2 %v911_v2  ;;  %503 = vmatpush.msrb.mxu0 %v1003_v21 }
 0x13f   :  { %483 = vmatpush.msrb.mxu3 %v998_v20  ;;  %v1495_v8 = vpop.f32.mrf.mxu0 }
 0x140   :  { %455 = vmatpush.msrb.mxu2 %v917_v3  ;;  %504 = vmatpush.msrb.mxu0 %v1024_v25  ;;  %1818 = vst [vmem:[#allocation7_spill] sm:$0xff] %v1495_v8 }
 0x141   :  { %484 = vmatpush.msrb.mxu3 %v1019_v24 }
 0x142   :  { %456 = vmatpush.msrb.mxu2 %v925_v5  ;;  %505 = vmatpush.msrb.mxu0 %v1045_v29 }
 0x143   :  { %485 = vmatpush.msrb.mxu3 %v1039_v28 }
 0x144   :  { %457 = vmatpush.msrb.mxu2 %v934_v7  ;;  %506 = vmatpush.msrb.mxu0 %v1066_v33 }
 0x145   :  { %486 = vmatpush.msrb.mxu3 %v1061_v32 }
 0x146   :  { %458 = vmatpush.msrb.mxu2 %v943_v9  ;;  %507 = vmatpush.msrb.mxu0 %v1087_v37 }
 0x147   :  { %487 = vmatpush.msrb.mxu3 %v1082_v36  ;;  %v1497_v12 = vpop.f32.mrf.mxu0 }
 0x148   :  { %459 = vmatpush.msrb.mxu2 %v952_v11  ;;  %508 = vmatpush.msrb.mxu0 %v1108_v41  ;;  %1819 = vst [vmem:[#allocation8_spill] sm:$0xff] %v1497_v12 }
 0x149   :  { %488 = vmatpush.msrb.mxu3 %v1103_v40 }
 0x14a   :  { %460 = vmatpush.msrb.mxu2 %v961_v13  ;;  %509 = vmatpush.msrb.mxu0 %v1129_v45 }
 0x14b   :  { %489 = vmatpush.msrb.mxu3 %v1124_v44 }
 0x14c   :  { %461 = vmatpush.msrb.mxu2 %v985_v18  ;;  %510 = vmatpush.msrb.mxu0 %v1216_v53 }
 0x14d   :  { %490 = vmatpush.msrb.mxu3 %v1211_v52 }
 0x14e   :  { %462 = vmatpush.msrb.mxu2 %v1011_v23  ;;  %511 = vmatpush.msrb.mxu0 %v1228_v55 }
 0x14f   :  { %491 = vmatpush.msrb.mxu3 %v1223_v54  ;;  %v1499_v22 = vpop.f32.mrf.mxu0 }
 0x150   :  { %463 = vmatpush.msrb.mxu2 %v1032_v27  ;;  %512 = vmatpush.msrb.mxu0 %v1242_v57  ;;  %1820 = vst [vmem:[#allocation9_spill] sm:$0xff] %v1499_v22 }
 0x151   :  { %492 = vmatpush.msrb.mxu3 %v1237_v56 }
 0x152   :  { %464 = vmatpush.msrb.mxu2 %v1053_v31  ;;  %513 = vmatpush.msrb.mxu0 %v1256_v59 }
 0x153   :  { %493 = vmatpush.msrb.mxu3 %v1251_v58 }
 0x154   :  { %465 = vmatpush.msrb.mxu2 %v1074_v35  ;;  %514 = vmatpush.msrb.mxu0 %v1266_v61 }
 0x155   :  { %494 = vmatpush.msrb.mxu3 %v1261_v60 }
 0x156   :  { %466 = vmatpush.msrb.mxu2 %v1095_v39  ;;  %515 = vmatpush.msrb.mxu0 %v1283_v0 }
 0x157   :  { %495 = vmatpush.msrb.mxu3 %v1278_v63  ;;  %v1501_v26 = vpop.f32.mrf.mxu0 }
 0x158   :  { %467 = vmatpush.msrb.mxu2 %v1116_v43  ;;  %516 = vmatpush.msrb.mxu0 %v1296_v4  ;;  %1821 = vst [vmem:[#allocation10_spill] sm:$0xff] %v1501_v26 }
 0x159   :  { %496 = vmatpush.msrb.mxu3 %v1291_v1 }
 0x15a   :  { %468 = vmatpush.msrb.mxu2 %v1137_v47 }
 0x15c   :  { %469 = vmatpush.msrb.mxu2 %v1148_v49 }
 0x15f   :  { %v1503_v30 = vpop.f32.mrf.mxu0 }
 0x160   :  { %1822 = vst [vmem:[#allocation11_spill] sm:$0xff] %v1503_v30 }
 0x1b6   :  { %v327_v42 = vpop.f32.mrf.mxu0 }
 0x1b7   :  { %v332_v48 = vadd.f32 %v327_v42, %v81_v34 }
 0x1b9   :  { %817 = vtanh.f32 %v332_v48 }
 0x1bc   :  { %v302_v49 = vpop.f32.mrf.mxu3 }
 0x1bf   :  { %v818_v62 = vpop.eup %817 }
 0x1c0   :  { %v334_v47 = vsub.f32 %v818_v62, %v1434_v50  ;;  %v282_v43 = vpop.f32.mrf.mxu2 }
 0x1c1   :  { %v303_v39 = vadd.f32 %v302_v49, %v282_v43 }
 0x1c2   :  { %v335_v8 = vmul.f32 %v1357_v38, %v334_v47 }
 0x1c3   :  { %v305_v12 = vadd.f32 %v1428_v17, %v303_v39 }
 0x1c4   :  { %v1510_v22 = vadd.f32 %v335_v8, %v1434_v50  ;;  %v1823_v50 = vld [vmem:[#allocation3_spill] sm:$0xff]  ;;  %v1826_v8 = vld [vmem:[#allocation6_spill] sm:$0xff] }
 0x1c5   :  { %819 = vtanh.f32 %v305_v12  ;;  %v1827_v12 = vld [vmem:[#allocation7_spill] sm:$0xff] }
 0x1c6   :  { %373 = vmatmul.f32.vlgmr.msra.gmra.mxu2 %v1510_v22  ;;  %398 = vmatmul.f32.vlgmr.msra.gmra.mxu3 %v1510_v22  ;;  %v84_v34 = vadd.f32 %v1334_v10, %v1827_v12 }
 0x1c7   :  { %573 = vmatpush.msra.mxu3 %v972_v15  ;;  %553 = vmatpush.msra.mxu2 %v967_v14 }
 0x1c9   :  { %574 = vmatpush.msra.mxu3 %v992_v19  ;;  %554 = vmatpush.msra.mxu2 %v977_v16 }
 0x1cb   :  { %v820_v43 = vpop.eup %819  ;;  %575 = vmatpush.msra.mxu3 %v1003_v21  ;;  %555 = vmatpush.msra.mxu2 %v998_v20 }
 0x1cc   :  { %v307_v39 = vsub.f32 %v820_v43, %v1446_v6 }
 0x1cd   :  { %576 = vmatpush.msra.mxu3 %v1024_v25  ;;  %556 = vmatpush.msra.mxu2 %v1019_v24 }
 0x1ce   :  { %v308_v47 = vmul.f32 %v1439_v51, %v307_v39 }
 0x1cf   :  { %577 = vmatpush.msra.mxu3 %v1045_v29  ;;  %557 = vmatpush.msra.mxu2 %v1039_v28 }
 0x1d0   :  { %v1527_v49 = vadd.f32 %v308_v47, %v1446_v6  ;;  %v1824_v6 = vld [vmem:[#allocation4_spill] sm:$0xff] }
 0x1d1   :  { %578 = vmatpush.msra.mxu3 %v1066_v33  ;;  %558 = vmatpush.msra.mxu2 %v1061_v32 }
 0x1d2   :  { %353 = vmatmul.f32.vlgmr.msra.gmra.mxu1 %v1527_v49 }
 0x1d3   :  { %526 = vmatpush.msra.mxu1 %v911_v2  ;;  %579 = vmatpush.msra.mxu3 %v1087_v37 }
 0x1d4   :  { %559 = vmatpush.msra.mxu2 %v1082_v36 }
 0x1d5   :  { %527 = vmatpush.msra.mxu1 %v917_v3  ;;  %580 = vmatpush.msra.mxu3 %v1108_v41 }
 0x1d6   :  { %560 = vmatpush.msra.mxu2 %v1103_v40 }
 0x1d7   :  { %528 = vmatpush.msra.mxu1 %v925_v5  ;;  %581 = vmatpush.msra.mxu3 %v1129_v45 }
 0x1d8   :  { %561 = vmatpush.msra.mxu2 %v1124_v44 }
 0x1d9   :  { %529 = vmatpush.msra.mxu1 %v934_v7  ;;  %582 = vmatpush.msra.mxu3 %v1216_v53 }
 0x1da   :  { %562 = vmatpush.msra.mxu2 %v1211_v52 }
 0x1db   :  { %530 = vmatpush.msra.mxu1 %v943_v9  ;;  %583 = vmatpush.msra.mxu3 %v1228_v55 }
 0x1dc   :  { %563 = vmatpush.msra.mxu2 %v1223_v54 }
 0x1dd   :  { %531 = vmatpush.msra.mxu1 %v952_v11  ;;  %584 = vmatpush.msra.mxu3 %v1242_v57 }
 0x1de   :  { %564 = vmatpush.msra.mxu2 %v1237_v56 }
 0x1df   :  { %532 = vmatpush.msra.mxu1 %v961_v13  ;;  %585 = vmatpush.msra.mxu3 %v1256_v59 }
 0x1e0   :  { %565 = vmatpush.msra.mxu2 %v1251_v58 }
 0x1e1   :  { %533 = vmatpush.msra.mxu1 %v985_v18  ;;  %586 = vmatpush.msra.mxu3 %v1266_v61 }
 0x1e2   :  { %566 = vmatpush.msra.mxu2 %v1261_v60 }
 0x1e3   :  { %534 = vmatpush.msra.mxu1 %v1011_v23  ;;  %587 = vmatpush.msra.mxu3 %v1283_v0 }
 0x1e4   :  { %567 = vmatpush.msra.mxu2 %v1278_v63 }
 0x1e5   :  { %535 = vmatpush.msra.mxu1 %v1032_v27  ;;  %588 = vmatpush.msra.mxu3 %v1296_v4 }
 0x1e6   :  { %568 = vmatpush.msra.mxu2 %v1291_v1 }
 0x1e7   :  { %536 = vmatpush.msra.mxu1 %v1053_v31 }
 0x1e9   :  { %537 = vmatpush.msra.mxu1 %v1074_v35 }
 0x1eb   :  { %538 = vmatpush.msra.mxu1 %v1823_v50 }
 0x1ed   :  { %539 = vmatpush.msra.mxu1 %v1824_v6 }
 0x1ef   :  { %540 = vmatpush.msra.mxu1 %v1825_v46 }
 0x1f1   :  { %541 = vmatpush.msra.mxu1 %v1826_v8 }
 0x249   :  { %v399_v42 = vpop.f32.mrf.mxu3  ;;  %v374_v62 = vpop.f32.mrf.mxu2 }
 0x24a   :  { %v404_v48 = vadd.f32 %v399_v42, %v84_v34 }
 0x24c   :  { %821 = vtanh.f32 %v404_v48  ;;  %v843_v48 = vld [vmem:[%s1798_s3 + $0xf8] sm:$0xff] }
 0x24f   :  { %v354_v43 = vpop.f32.mrf.mxu1 }
 0x250   :  { %v375_v39 = vadd.f32 %v374_v62, %v354_v43  ;;  %v847_v43 = vld [vmem:[%s1798_s3 + $0x68] sm:$0xff] }
 0x252   :  { %v822_v47 = vpop.eup %821  ;;  %v377_v30 = vadd.f32 %v1428_v17, %v375_v39 }
 0x253   :  { %v406_v26 = vsub.f32 %v822_v47, %v1510_v22 }
 0x254   :  { %823 = vtanh.f32 %v377_v30 }
 0x255   :  { %v407_v6 = vmul.f32 %v1357_v38, %v406_v26 }
 0x257   :  { %v1574_v46 = vadd.f32 %v407_v6, %v1510_v22 }
 0x259   :  { %445 = vmatmul.f32.vlgmr.msrb.gmra.mxu1 %v1574_v46  ;;  %470 = vmatmul.f32.vlgmr.msrb.gmra.mxu2 %v1574_v46 }
 0x25a   :  { %v824_v12 = vpop.eup %823  ;;  %645 = vmatpush.msrb.mxu2 %v972_v15  ;;  %625 = vmatpush.msrb.mxu1 %v967_v14 }
 0x25b   :  { %v379_v34 = vsub.f32 %v824_v12, %v1527_v49 }
 0x25c   :  { %646 = vmatpush.msrb.mxu2 %v992_v19  ;;  %626 = vmatpush.msrb.mxu1 %v977_v16 }
 0x25d   :  { %v380_v26 = vmul.f32 %v1439_v51, %v379_v34 }
 0x25e   :  { %647 = vmatpush.msrb.mxu2 %v1003_v21  ;;  %627 = vmatpush.msrb.mxu1 %v998_v20 }
 0x25f   :  { %v1587_v22 = vadd.f32 %v380_v26, %v1527_v49 }
 0x260   :  { %648 = vmatpush.msrb.mxu2 %v1024_v25  ;;  %628 = vmatpush.msrb.mxu1 %v1019_v24 }
 0x261   :  { %425 = vmatmul.f32.vlgmr.msra.gmra.mxu0 %v1587_v22 }
 0x262   :  { %598 = vmatpush.msra.mxu0 %v911_v2  ;;  %649 = vmatpush.msrb.mxu2 %v1045_v29  ;;  %v1828_v2 = vld [vmem:[#allocation4_spill] sm:$0xff] }
 0x263   :  { %629 = vmatpush.msrb.mxu1 %v1039_v28 }
 0x264   :  { %599 = vmatpush.msra.mxu0 %v917_v3  ;;  %650 = vmatpush.msrb.mxu2 %v1066_v33  ;;  %v1829_v3 = vld [vmem:[#allocation5_spill] sm:$0xff] }
 0x265   :  { %630 = vmatpush.msrb.mxu1 %v1061_v32 }
 0x266   :  { %600 = vmatpush.msra.mxu0 %v925_v5  ;;  %651 = vmatpush.msrb.mxu2 %v1087_v37  ;;  %v1830_v5 = vld [vmem:[#allocation8_spill] sm:$0xff] }
 0x267   :  { %631 = vmatpush.msrb.mxu1 %v1082_v36 }
 0x268   :  { %601 = vmatpush.msra.mxu0 %v934_v7  ;;  %652 = vmatpush.msrb.mxu2 %v1108_v41  ;;  %v87_v7 = vadd.f32 %v1334_v10, %v1830_v5 }
 0x269   :  { %632 = vmatpush.msrb.mxu1 %v1103_v40 }
 0x26a   :  { %602 = vmatpush.msra.mxu0 %v943_v9  ;;  %653 = vmatpush.msrb.mxu2 %v1129_v45 }
 0x26b   :  { %633 = vmatpush.msrb.mxu1 %v1124_v44 }
 0x26c   :  { %603 = vmatpush.msra.mxu0 %v952_v11  ;;  %654 = vmatpush.msrb.mxu2 %v1216_v53 }
 0x26d   :  { %634 = vmatpush.msrb.mxu1 %v1211_v52 }
 0x26e   :  { %604 = vmatpush.msra.mxu0 %v961_v13  ;;  %655 = vmatpush.msrb.mxu2 %v1228_v55 }
 0x26f   :  { %635 = vmatpush.msrb.mxu1 %v1223_v54 }
 0x270   :  { %605 = vmatpush.msra.mxu0 %v985_v18  ;;  %656 = vmatpush.msrb.mxu2 %v1242_v57 }
 0x271   :  { %636 = vmatpush.msrb.mxu1 %v1237_v56 }
 0x272   :  { %606 = vmatpush.msra.mxu0 %v1011_v23  ;;  %657 = vmatpush.msrb.mxu2 %v1256_v59 }
 0x273   :  { %637 = vmatpush.msrb.mxu1 %v1251_v58 }
 0x274   :  { %607 = vmatpush.msra.mxu0 %v1032_v27  ;;  %658 = vmatpush.msrb.mxu2 %v1266_v61 }
 0x275   :  { %638 = vmatpush.msrb.mxu1 %v1261_v60 }
 0x276   :  { %608 = vmatpush.msra.mxu0 %v1053_v31  ;;  %659 = vmatpush.msrb.mxu2 %v1283_v0 }
 0x277   :  { %639 = vmatpush.msrb.mxu1 %v1278_v63 }
 0x278   :  { %609 = vmatpush.msra.mxu0 %v1074_v35  ;;  %660 = vmatpush.msrb.mxu2 %v1296_v4 }
 0x279   :  { %640 = vmatpush.msrb.mxu1 %v1291_v1 }
 0x27a   :  { %610 = vmatpush.msra.mxu0 %v1823_v50 }
 0x27c   :  { %611 = vmatpush.msra.mxu0 %v1828_v2 }
 0x27e   :  { %612 = vmatpush.msra.mxu0 %v1829_v3 }
 0x280   :  { %613 = vmatpush.msra.mxu0 %v1826_v8 }
 0x2d6   :  { %v446_v13 = vpop.f32.mrf.mxu1 }
 0x2dc   :  { %v471_v9 = vpop.f32.mrf.mxu2 }
 0x2dd   :  { %v476_v11 = vadd.f32 %v471_v9, %v87_v7  ;;  %v1833_v7 = vld [vmem:[#allocation11_spill] sm:$0xff] }
 0x2de   :  { %v426_v14 = vpop.f32.mrf.mxu0  ;;  %v96_v9 = vadd.f32 %v1334_v10, %v1833_v7 }
 0x2df   :  { %825 = vtanh.f32 %v476_v11  ;;  %v447_v16 = vadd.f32 %v446_v13, %v426_v14 }
 0x2e1   :  { %v449_v18 = vadd.f32 %v1428_v17, %v447_v16 }
 0x2e3   :  { %827 = vtanh.f32 %v449_v18 }
 0x2e5   :  { %v826_v23 = vpop.eup %825 }
 0x2e6   :  { %v478_v27 = vsub.f32 %v826_v23, %v1574_v46 }
 0x2e8   :  { %v479_v31 = vmul.f32 %v1357_v38, %v478_v27 }
 0x2e9   :  { %v828_v30 = vpop.eup %827 }
 0x2ea   :  { %v451_v49 = vsub.f32 %v828_v30, %v1587_v22  ;;  %v1639_v6 = vadd.f32 %v479_v31, %v1574_v46  ;;  %v844_v46 = vld [vmem:[%s1798_s3 + $0xf0] sm:$0xff] }
 0x2ec   :  { %517 = vmatmul.f32.vlgmr.msrb.gmra.mxu0 %v1639_v6  ;;  %542 = vmatmul.f32.vlgmr.msra.gmra.mxu1 %v1639_v6  ;;  %v452_v42 = vmul.f32 %v1439_v51, %v451_v49 }
 0x2ed   :  { %717 = vmatpush.msra.mxu1 %v972_v15  ;;  %697 = vmatpush.msrb.mxu0 %v843_v48  ;;  %v845_v15 = vld [vmem:[%s1798_s3 + $0x78] sm:$0xff] }
 0x2ee   :  { %v1649_v62 = vadd.f32 %v452_v42, %v1587_v22 }
 0x2ef   :  { %718 = vmatpush.msra.mxu1 %v992_v19  ;;  %698 = vmatpush.msrb.mxu0 %v844_v46  ;;  %v846_v19 = vld [vmem:[%s1798_s3 + $0x70] sm:$0xff]  ;;  %v755_v46 = vld [vmem:[%s1804_s6 + $0x68] sm:$0xff] }
 0x2f0   :  { %497 = vmatmul.f32.vlgmr.msrb.gmra.mxu3 %v1649_v62 }
 0x2f1   :  { %670 = vmatpush.msrb.mxu3 %v845_v15  ;;  %719 = vmatpush.msra.mxu1 %v1003_v21  ;;  %v849_v21 = vld [vmem:[%s1798_s3 + $0x58] sm:$0xff]  ;;  %v754_v15 = vld [vmem:[%s1804_s6 + $0x60] sm:$0xff] }
 0x2f2   :  { %699 = vmatpush.msrb.mxu0 %v998_v20  ;;  %v848_v20 = vld [vmem:[%s1798_s3 + $0x60] sm:$0xff] }
 0x2f3   :  { %671 = vmatpush.msrb.mxu3 %v846_v19  ;;  %720 = vmatpush.msra.mxu1 %v1024_v25  ;;  %v851_v25 = vld [vmem:[%s1798_s3 + $0x48] sm:$0xff]  ;;  %v753_v19 = vld [vmem:[%s1804_s6 + $0x58] sm:$0xff] }
 0x2f4   :  { %700 = vmatpush.msrb.mxu0 %v1019_v24  ;;  %v850_v24 = vld [vmem:[%s1798_s3 + $0x50] sm:$0xff] }
 0x2f5   :  { %672 = vmatpush.msrb.mxu3 %v847_v43  ;;  %721 = vmatpush.msra.mxu1 %v1045_v29  ;;  %v853_v29 = vld [vmem:[%s1798_s3 + $0x38] sm:$0xff]  ;;  %v752_v43 = vld [vmem:[%s1804_s6 + $0x50] sm:$0xff] }
 0x2f6   :  { %701 = vmatpush.msrb.mxu0 %v1039_v28  ;;  %v852_v28 = vld [vmem:[%s1798_s3 + $0x40] sm:$0xff] }
 0x2f7   :  { %673 = vmatpush.msrb.mxu3 %v848_v20  ;;  %722 = vmatpush.msra.mxu1 %v1066_v33  ;;  %v855_v33 = vld [vmem:[%s1798_s3 + $0x28] sm:$0xff] }
 0x2f8   :  { %702 = vmatpush.msrb.mxu0 %v1061_v32  ;;  %v854_v32 = vld [vmem:[%s1798_s3 + $0x30] sm:$0xff]  ;;  %v751_v20 = vld [vmem:[%s1804_s6 + $0x48] sm:$0xff] }
 0x2f9   :  { %674 = vmatpush.msrb.mxu3 %v849_v21  ;;  %723 = vmatpush.msra.mxu1 %v1087_v37  ;;  %v750_v21 = vld [vmem:[%s1804_s6 + $0x40] sm:$0xff] }
 0x2fa   :  { %703 = vmatpush.msrb.mxu0 %v1082_v36 }
 0x2fb   :  { %675 = vmatpush.msrb.mxu3 %v850_v24  ;;  %724 = vmatpush.msra.mxu1 %v1108_v41  ;;  %v749_v24 = vld [vmem:[%s1804_s6 + $0x38] sm:$0xff] }
 0x2fc   :  { %704 = vmatpush.msrb.mxu0 %v1103_v40 }
 0x2fd   :  { %676 = vmatpush.msrb.mxu3 %v851_v25  ;;  %725 = vmatpush.msra.mxu1 %v1129_v45  ;;  %v748_v25 = vld [vmem:[%s1804_s6 + $0x30] sm:$0xff] }
 0x2fe   :  { %705 = vmatpush.msrb.mxu0 %v1124_v44 }
 0x2ff   :  { %677 = vmatpush.msrb.mxu3 %v852_v28  ;;  %726 = vmatpush.msra.mxu1 %v1216_v53  ;;  %v747_v28 = vld [vmem:[%s1804_s6 + $0x28] sm:$0xff] }
 0x300   :  { %706 = vmatpush.msrb.mxu0 %v1211_v52 }
 0x301   :  { %678 = vmatpush.msrb.mxu3 %v853_v29  ;;  %727 = vmatpush.msra.mxu1 %v1228_v55  ;;  %v746_v29 = vld [vmem:[%s1804_s6 + $0x20] sm:$0xff] }
 0x302   :  { %707 = vmatpush.msrb.mxu0 %v1223_v54 }
 0x303   :  { %679 = vmatpush.msrb.mxu3 %v854_v32  ;;  %728 = vmatpush.msra.mxu1 %v1242_v57  ;;  %v745_v32 = vld [vmem:[%s1804_s6 + $0x18] sm:$0xff] }
 0x304   :  { %708 = vmatpush.msrb.mxu0 %v1237_v56 }
 0x305   :  { %680 = vmatpush.msrb.mxu3 %v855_v33  ;;  %729 = vmatpush.msra.mxu1 %v1256_v59  ;;  %v744_v33 = vld [vmem:[%s1804_s6 + $0x10] sm:$0xff] }
 0x306   :  { %709 = vmatpush.msrb.mxu0 %v1251_v58 }
 0x307   :  { %681 = vmatpush.msrb.mxu3 %v1074_v35  ;;  %730 = vmatpush.msra.mxu1 %v1266_v61  ;;  %v1831_v35 = vld [vmem:[#allocation9_spill] sm:$0xff]  ;;  %v1832_v61 = vld [vmem:[#allocation10_spill] sm:$0xff] }
 0x308   :  { %710 = vmatpush.msrb.mxu0 %v1261_v60  ;;  %v90_v36 = vadd.f32 %v1334_v10, %v1831_v35  ;;  %v743_v35 = vld [vmem:[%s1804_s6 + $0x8] sm:$0xff] }
 0x309   :  { %682 = vmatpush.msrb.mxu3 %v1823_v50  ;;  %731 = vmatpush.msra.mxu1 %v1283_v0 }
 0x30a   :  { %711 = vmatpush.msrb.mxu0 %v1278_v63  ;;  %v93_v63 = vadd.f32 %v1334_v10, %v1832_v61 }
 0x30b   :  { %683 = vmatpush.msrb.mxu3 %v1828_v2  ;;  %732 = vmatpush.msra.mxu1 %v1296_v4 }
 0x30c   :  { %712 = vmatpush.msrb.mxu0 %v1291_v1 }
 0x30d   :  { %684 = vmatpush.msrb.mxu3 %v1829_v3 }
 0x30f   :  { %685 = vmatpush.msrb.mxu3 %v1826_v8 }
 0x369   :  { %v543_v37 = vpop.f32.mrf.mxu1  ;;  %v518_v44 = vpop.f32.mrf.mxu0 }
 0x36a   :  { %v548_v40 = vadd.f32 %v543_v37, %v90_v36  ;;  %v742_v36 = vld [vmem:[%s1804_s6] sm:$0xff] }
 0x36c   :  { %829 = vtanh.f32 %v548_v40 }
 0x372   :  { %v830_v41 = vpop.eup %829 }
 0x373   :  { %v550_v45 = vsub.f32 %v830_v41, %v1639_v6  ;;  %v498_v52 = vpop.f32.mrf.mxu3 }
 0x374   :  { %v519_v53 = vadd.f32 %v518_v44, %v498_v52 }
 0x375   :  { %v551_v54 = vmul.f32 %v1357_v38, %v550_v45 }
 0x376   :  { %v521_v55 = vadd.f32 %v1428_v17, %v519_v53 }
 0x377   :  { %v552_v56 = vadd.f32 %v551_v54, %v1639_v6 }
 0x378   :  { %831 = vtanh.f32 %v521_v55  ;;  %v810_v55 = vld [vmem:[%s1803_s7] ss:$0 sm:$0xff] }
 0x379   :  { %589 = vmatmul.f32.vlgmr.msra.gmra.mxu3 %v552_v56  ;;  %614 = vmatmul.f32.vlgmr.msra.gmra.mxu0 %v552_v56 }
 0x37e   :  { %v832_v57 = vpop.eup %831 }
 0x37f   :  { %v523_v58 = vsub.f32 %v832_v57, %v1649_v62 }
 0x381   :  { %v524_v59 = vmul.f32 %v1439_v51, %v523_v58 }
 0x383   :  { %v525_v60 = vadd.f32 %v524_v59, %v1649_v62  ;;  %v757_v62 = vld [vmem:[%s1804_s6 + $0x78] sm:$0xff] }
 0x385   :  { %569 = vmatmul.f32.vlgmr.msra.gmra.mxu2 %v525_v60 }
 0x386   :  { %762 = vmatpush.msra.mxu2 %v757_v62 }
 0x3f6   :  { %v615_v0 = vpop.f32.mrf.mxu0 }
 0x3f7   :  { %v620_v1 = vadd.f32 %v615_v0, %v93_v63 }
 0x3f9   :  { %833 = vtanh.f32 %v620_v1 }
 0x3fc   :  { %v590_v47 = vpop.f32.mrf.mxu3 }
 0x3ff   :  { %v834_v4 = vpop.eup %833 }
 0x400   :  { %v622_v50 = vsub.f32 %v834_v4, %v552_v56 }
 0x402   :  { %v623_v8 = vmul.f32 %v1357_v38, %v622_v50 }
 0x404   :  { %v624_v39 = vadd.f32 %v623_v8, %v552_v56 }
 0x406   :  { %661 = vmatmul.f32.vlgmr.msrb.gmra.mxu2 %v624_v39  ;;  %686 = vmatmul.f32.vlgmr.msrb.gmra.mxu3 %v624_v39 }
 0x408   :  { %v570_v12 = vpop.f32.mrf.mxu2 }
 0x409   :  { %v591_v34 = vadd.f32 %v590_v47, %v570_v12 }
 0x40b   :  { %v593_v26 = vadd.f32 %v1428_v17, %v591_v34 }
 0x40d   :  { %835 = vtanh.f32 %v593_v26 }
 0x413   :  { %v836_v22 = vpop.eup %835 }
 0x414   :  { %v595_v2 = vsub.f32 %v836_v22, %v525_v60 }
 0x416   :  { %v596_v3 = vmul.f32 %v1439_v51, %v595_v2 }
 0x418   :  { %v597_v5 = vadd.f32 %v596_v3, %v525_v60 }
 0x41a   :  { %641 = vmatmul.f32.vlgmr.msrb.gmra.mxu1 %v597_v5 }
 0x489   :  { %v687_v11 = vpop.f32.mrf.mxu3  ;;  %v662_v23 = vpop.f32.mrf.mxu2 }
 0x48a   :  { %v692_v13 = vadd.f32 %v687_v11, %v96_v9 }
 0x48c   :  { %837 = vtanh.f32 %v692_v13 }
 0x492   :  { %v838_v14 = vpop.eup %837 }
 0x493   :  { %v694_v16 = vsub.f32 %v838_v14, %v624_v39 }
 0x495   :  { %v695_v18 = vmul.f32 %v1357_v38, %v694_v16  ;;  %v756_v38 = vld [vmem:[%s1804_s6 + $0x70] sm:$0xff] }
 0x496   :  { %763 = vmatpush.msra.mxu2 %v756_v38 }
 0x497   :  { %v642_v27 = vpop.f32.mrf.mxu1  ;;  %v696_v31 = vadd.f32 %v695_v18, %v624_v39 }
 0x498   :  { %v663_v30 = vadd.f32 %v662_v23, %v642_v27  ;;  %764 = vmatpush.msra.mxu2 %v755_v46 }
 0x499   :  { %733 = vmatmul.f32.vlgmr.msra.gmra.mxu1 %v696_v31 }
 0x49a   :  { %v665_v49 = vadd.f32 %v1428_v17, %v663_v30  ;;  %765 = vmatpush.msra.mxu2 %v754_v15 }
 0x49c   :  { %839 = vtanh.f32 %v665_v49  ;;  %766 = vmatpush.msra.mxu2 %v753_v19 }
 0x49e   :  { %767 = vmatpush.msra.mxu2 %v752_v43 }
 0x4a0   :  { %768 = vmatpush.msra.mxu2 %v751_v20 }
 0x4a2   :  { %v840_v6 = vpop.eup %839  ;;  %769 = vmatpush.msra.mxu2 %v750_v21 }
 0x4a3   :  { %v667_v42 = vsub.f32 %v840_v6, %v597_v5 }
 0x4a4   :  { %770 = vmatpush.msra.mxu2 %v749_v24 }
 0x4a5   :  { %v668_v48 = vmul.f32 %v1439_v51, %v667_v42 }
 0x4a6   :  { %771 = vmatpush.msra.mxu2 %v748_v25 }
 0x4a7   :  { %v669_v10 = vadd.f32 %v668_v48, %v597_v5 }
 0x4a8   :  { %772 = vmatpush.msra.mxu2 %v747_v28 }
 0x4a9   :  { %713 = vmatmul.f32.vlgmr.msrb.gmra.mxu0 %v669_v10 }
 0x4aa   :  { %773 = vmatpush.msra.mxu2 %v746_v29 }
 0x4ac   :  { %774 = vmatpush.msra.mxu2 %v745_v32 }
 0x4ae   :  { %775 = vmatpush.msra.mxu2 %v744_v33 }
 0x4b0   :  { %776 = vmatpush.msra.mxu2 %v743_v35 }
 0x4b2   :  { %777 = vmatpush.msra.mxu2 %v742_v36 }
 0x516   :  { %v734_v37 = vpop.f32.mrf.mxu1 }
 0x526   :  { %v714_v40 = vpop.f32.mrf.mxu0 }
 0x527   :  { %v735_v41 = vadd.f32 %v734_v37, %v714_v40 }
 0x529   :  { %v737_v44 = vadd.f32 %v1428_v17, %v735_v41 }
 0x52b   :  { %841 = vtanh.f32 %v737_v44 }
 0x531   :  { %v842_v45 = vpop.eup %841 }
 0x532   :  { %v739_v52 = vsub.f32 %v842_v45, %v669_v10 }
 0x534   :  { %v740_v53 = vmul.f32 %v1439_v51, %v739_v52 }
 0x536   :  { %v741_v54 = vadd.f32 %v740_v53, %v669_v10 }
 0x538   :  { %778 = vmatmul.f32.vlgmr.msra.gmra.mxu2 %v741_v54 }
 0x5bb   :  { %v779_v56 = vpop.f32.mrf.mxu2 }
 0x5bc   :  { %v780_v57 = vadd.f32 %v810_v55, %v779_v56 }
 0x5be   :  { %782 = vst [vmem:[%s1805_s8] sm:$0xff] %v780_v57 }

</bundles_post_ra>
